<compile_context>
chip_gen: v6e
topology: v6e:2x2x1
jax: 0.10.0
libtpu: 0.0.40
codegen_flags: <defaults>
</compile_context>

<pallas_src>
import math

import jax
import jax.numpy as jnp
import numpy as np
from jax.experimental import pallas as pl
from jax.experimental.pallas import tpu as pltpu

H_NUM = 8                      # self.h_num in the PyTorch module (hard-coded to 8)
NEG_INF = -1000000000.0        # masked_fill value used by the module


def _coattention_kernel(x1_ref, x2_ref, vbias_ref, qbias_ref,
                        wqt_ref, bq_ref, wrt_ref, br_ref,
                        emb1_ref, emb2_ref, v2q_ref, q2v_ref):
    """One batch element per grid step.  All tensors live fully in VMEM."""
    f32 = jnp.float32
    bf16 = jnp.bfloat16

    x1 = x1_ref[0]                 # (N1, d1) f32
    x2 = x2_ref[0]                 # (N2, d2) f32
    vbias = vbias_ref[0]           # (N1, 1)  additive bias: NEG_INF where masked
    qbias = qbias_ref[0]           # (N2, 1)  additive bias: NEG_INF where masked
    wq_t = wqt_ref[...]            # (d1, d2) bf16  (stacked per-head projections, pre-transposed)
    bq = bq_ref[...]               # (1, d2)  f32
    wr_t = wrt_ref[...]            # (d2, d1) bf16  (v_reform weight, pre-transposed)
    br = br_ref[...]               # (1, d1)  f32

    N1, d1 = x1.shape
    N2, d2 = x2.shape
    Hd = d2 // H_NUM
    scale = 1.0 / math.sqrt(Hd)

    # Multi-head projection of x1: the 8 per-head Linears concatenated along the
    # output dim are one (d1 -> d2) matmul.  bf16 operands, f32 accumulation.
    Q = jnp.dot(x1.astype(bf16), wq_t, preferred_element_type=f32) + bq      # (N1, d2)

    # AvgPool1d over the sequence axis -> per-feature gates.  A per-column gate
    # commutes with the row-mixing attention matmul, so it is applied AFTER the
    # attention mix, in merged (N, d2) layout (no per-head gate slices needed).
    gate1 = jnp.mean(Q, axis=0, keepdims=True)                                # (1, d2)
    gate2 = jnp.mean(x2, axis=0, keepdims=True)                               # (1, d2)

    # Head split once (lane slices stacked on a new major axis); everything below
    # is head-batched: 4 batched MXU einsums instead of 16 tiny per-head matmuls.
    Qh = jnp.stack([Q[:, h * Hd:(h + 1) * Hd] for h in range(H_NUM)],
                   axis=0).astype(bf16)                                       # (H, N1, Hd)
    Dh = jnp.stack([x2[:, h * Hd:(h + 1) * Hd] for h in range(H_NUM)],
                   axis=0).astype(bf16)                                       # (H, N2, Hd)

    # Affinity in both orientations straight off the MXU -- this removes every
    # explicit transpose and lets v2q be stored in its native (H, N2, N1) layout.
    aff = jnp.einsum('hid,hjd->hij', Qh, Dh, preferred_element_type=f32) * scale   # (H, N1, N2)
    affT = jnp.einsum('hjd,hid->hji', Dh, Qh, preferred_element_type=f32) * scale  # (H, N2, N1)

    # --- softmax over N2 (dim=3 in torch), q_mask additive bias, transposed layout -> v2q
    L1 = affT + qbias[None, :, :]
    m1 = jnp.max(L1, axis=1, keepdims=True)
    e1 = jnp.exp(L1 - m1)
    v2q = e1 * pl.reciprocal(jnp.sum(e1, axis=1, keepdims=True), approx=True)       # (H, N2, N1)
    v2q_ref[0] = v2q

    # --- softmax over N1 (dim=2 in torch), v_mask additive bias -> q2v
    L2 = aff + vbias[None, :, :]
    m2 = jnp.max(L2, axis=1, keepdims=True)
    e2 = jnp.exp(L2 - m2)
    q2v = e2 * pl.reciprocal(jnp.sum(e2, axis=1, keepdims=True), approx=True)       # (H, N1, N2)
    q2v_ref[0] = q2v

    # Attention-weighted mixes (standard batched 'bqk,bkd->bqd' contractions).
    x2h = jnp.einsum('hji,hid->hjd', v2q.astype(bf16), Qh,
                     preferred_element_type=f32)                              # (H, N2, Hd)
    x1h = jnp.einsum('hij,hjd->hid', q2v.astype(bf16), Dh,
                     preferred_element_type=f32)                              # (H, N1, Hd)

    # Merge heads back to (N, d2) and fold the gates in (merged-layout broadcast).
    x1_cat = jnp.concatenate([x1h[h] for h in range(H_NUM)], axis=1) * gate1  # (N1, d2)
    x2_cat = jnp.concatenate([x2h[h] for h in range(H_NUM)], axis=1) * gate2  # (N2, d2)

    # v_reform Linear (d2 -> d1) + sigmoid gating of the (full-precision) inputs.
    x1_r = jnp.dot(x1_cat.astype(bf16), wr_t, preferred_element_type=f32) + br  # (N1, d1)
    emb1_ref[0] = x1 * jax.nn.sigmoid(x1_r)
    emb2_ref[0] = x2 * jax.nn.sigmoid(x2_cat)


def coattention_pallas(x1, x2, v_mask, q_mask, wq, bq, wr, br):
    B, N1, d1 = x1.shape
    _, N2, d2 = x2.shape

    # --- one-time layout / dtype plumbing outside the kernel ---
    wq_t = jnp.transpose(wq).astype(jnp.bfloat16)       # (d1, d2)
    wr_t = jnp.transpose(wr).astype(jnp.bfloat16)       # (d2, d1)
    bq_f = bq.astype(jnp.float32)                        # (1, d2)
    br_f = br.astype(jnp.float32)                        # (1, d1)
    # masks -> additive f32 bias (0 where kept, NEG_INF where masked)
    vbias = jnp.where(v_mask > 0, jnp.float32(NEG_INF), jnp.float32(0.0))                    # (B, N1, 1)
    qbias = jnp.where(jnp.swapaxes(q_mask, 1, 2) > 0, jnp.float32(NEG_INF), jnp.float32(0.0))  # (B, N2, 1)

    out_shape = (
        jax.ShapeDtypeStruct((B, N1, d1), jnp.float32),          # emb1
        jax.ShapeDtypeStruct((B, N2, d2), jnp.float32),          # emb2
        jax.ShapeDtypeStruct((B, H_NUM, N2, N1), jnp.float32),   # v2q
        jax.ShapeDtypeStruct((B, H_NUM, N1, N2), jnp.float32),   # q2v
    )
    grid_spec = pltpu.PrefetchScalarGridSpec(
        num_scalar_prefetch=0,
        grid=(B,),
        in_specs=[
            pl.BlockSpec((1, N1, d1), lambda b: (b, 0, 0)),      # x1
            pl.BlockSpec((1, N2, d2), lambda b: (b, 0, 0)),      # x2
            pl.BlockSpec((1, N1, 1), lambda b: (b, 0, 0)),       # vbias
            pl.BlockSpec((1, N2, 1), lambda b: (b, 0, 0)),       # qbias
            pl.BlockSpec((d1, d2), lambda b: (0, 0)),            # wq_t
            pl.BlockSpec((1, d2), lambda b: (0, 0)),             # bq
            pl.BlockSpec((d2, d1), lambda b: (0, 0)),            # wr_t
            pl.BlockSpec((1, d1), lambda b: (0, 0)),             # br
        ],
        out_specs=[
            pl.BlockSpec((1, N1, d1), lambda b: (b, 0, 0)),
            pl.BlockSpec((1, N2, d2), lambda b: (b, 0, 0)),
            pl.BlockSpec((1, H_NUM, N2, N1), lambda b: (b, 0, 0, 0)),
            pl.BlockSpec((1, H_NUM, N1, N2), lambda b: (b, 0, 0, 0)),
        ],
    )
    return pl.pallas_call(
        _coattention_kernel,
        out_shape=out_shape,
        grid_spec=grid_spec,
        compiler_params=pltpu.CompilerParams(
            dimension_semantics=("parallel",),        # batch axis across TCs (v7x)
            vmem_limit_bytes=48 * 1024 * 1024,        # above v5e/v6e defaults, under v7x physical
        ),
    )(x1, x2, vbias, qbias, wq_t, bq_f, wr_t, br_f)


def init_params(key, d_model1, d_model2, num_heads):
    """Deterministic synthetic parameters (effective weights of the FCNets)."""
    hdim = d_model2 // num_heads
    keys = jax.random.split(key, 2 * num_heads + 2)
    w_list, b_list = [], []
    for h in range(num_heads):
        w_list.append(jax.random.normal(keys[2 * h], (hdim, d_model1), jnp.float32) * 0.1)
        b_list.append(jax.random.normal(keys[2 * h + 1], (hdim,), jnp.float32) * 0.1)
    wq = jnp.concatenate(w_list, axis=0)                  # (d2, d1)
    bq = jnp.concatenate(b_list, axis=0)[None, :]         # (1, d2)
    wr = jax.random.normal(keys[-2], (d_model1, d_model2), jnp.float32) * 0.1
    br = (jax.random.normal(keys[-1], (d_model1,), jnp.float32) * 0.1)[None, :]
    return wq, bq, wr, br


def coattention_ref(x1, x2, v_mask, q_mask, wq, bq, wr, br):
    """Pure-JAX reference mirroring the PyTorch forward (eval mode, f32)."""
    B, N1, d1 = x1.shape
    _, N2, d2 = x2.shape
    H = d2 // H_NUM
    Q = x1 @ wq.T + bq[0]
    gate1 = jnp.mean(Q, axis=1).reshape(B, 1, H_NUM, H).transpose(0, 2, 1, 3)
    gate2 = jnp.mean(x2, axis=1).reshape(B, 1, H_NUM, H).transpose(0, 2, 1, 3)
    Qh = Q.reshape(B, N1, H_NUM, H).transpose(0, 2, 1, 3)
    Dh = x2.reshape(B, N2, H_NUM, H).transpose(0, 2, 1, 3)
    aff = jnp.einsum('bhid,bhjd->bhij', Qh, Dh) / math.sqrt(H)
    qm = q_mask[:, None, :, :] > 0     # (B,1,1,N2)
    vm = v_mask[:, None, :, :] > 0     # (B,1,N1,1)
    L1 = jnp.where(qm, NEG_INF, aff)
    v2q = jnp.swapaxes(jax.nn.softmax(L1, axis=3), 2, 3)
    x2_ = jnp.einsum('bhji,bhid->bhjd', v2q, Qh * gate2)
    L2 = jnp.where(vm, NEG_INF, aff)
    q2v = jax.nn.softmax(L2, axis=2)
    x1_ = jnp.einsum('bhij,bhjd->bhid', q2v, Dh * gate1)
    x1_ = x1_.transpose(0, 2, 1, 3).reshape(B, N1, d2)
    x2_ = x2_.transpose(0, 2, 1, 3).reshape(B, N2, d2)
    x1_ = x1_ @ wr.T + br[0]
    emb1 = x1 * jax.nn.sigmoid(x1_)
    emb2 = x2 * jax.nn.sigmoid(x2_)
    return emb1, emb2, v2q, q2v


if __name__ == "__main__":
    B, N1, N2 = 2, 16, 8
    d_model1, d_model2, num_heads = 32, 32, 8

    key = jax.random.PRNGKey(0)
    k_x1, k_x2, k_p = jax.random.split(key, 3)
    x1 = jax.random.normal(k_x1, (B, N1, d_model1), jnp.float32)
    x2 = jax.random.normal(k_x2, (B, N2, d_model2), jnp.float32)

    # Masks: 1.0 == masked (torch boolean True). See `# layout:` comment above.
    v_mask_np = np.zeros((B, N1, 1), np.float32); v_mask_np[0, -2:, 0] = 1.0
    q_mask_np = np.zeros((B, 1, N2), np.float32); q_mask_np[1, 0, -1] = 1.0
    v_mask = jnp.asarray(v_mask_np)
    q_mask = jnp.asarray(q_mask_np)

    wq, bq, wr, br = init_params(k_p, d_model1, d_model2, num_heads)

    outs = coattention_pallas(x1, x2, v_mask, q_mask, wq, bq, wr, br)
    outs = jax.block_until_ready(outs)

    refs = coattention_ref(x1, x2, v_mask, q_mask, wq, bq, wr, br)
    for o, r in zip(outs, refs):
        np.testing.assert_allclose(np.asarray(o), np.asarray(r), rtol=5e-2, atol=5e-2)

    print("KERNEL_OK")
</pallas_src>

<mosaic_0001>
module attributes {stable_mosaic.version = 11 : i64} {
  func.func @_coattention_kernel(%arg0: i32, %arg1: memref<1x16x32xf32, #tpu.memory_space<vmem>>, %arg2: memref<1x8x32xf32, #tpu.memory_space<vmem>>, %arg3: memref<1x16x1xf32, #tpu.memory_space<vmem>>, %arg4: memref<1x8x1xf32, #tpu.memory_space<vmem>>, %arg5: memref<32x32xbf16, #tpu.memory_space<vmem>>, %arg6: memref<1x32xf32, #tpu.memory_space<vmem>>, %arg7: memref<32x32xbf16, #tpu.memory_space<vmem>>, %arg8: memref<1x32xf32, #tpu.memory_space<vmem>>, %arg9: memref<1x16x32xf32, #tpu.memory_space<vmem>>, %arg10: memref<1x8x32xf32, #tpu.memory_space<vmem>>, %arg11: memref<1x8x8x16xf32, #tpu.memory_space<vmem>>, %arg12: memref<1x8x16x8xf32, #tpu.memory_space<vmem>>) attributes {dimension_semantics = [#tpu.dimension_semantics<parallel>], iteration_bounds = array<i64: 2>, scalar_prefetch = 0 : i64, scratch_operands = 0 : i64, tpu.core_type = #tpu.core_type<tc>, window_params = [{transform_indices = @transform_0, window_bounds = array<i64: 1, 16, 32>}, {transform_indices = @transform_1, window_bounds = array<i64: 1, 8, 32>}, {transform_indices = @transform_2, window_bounds = array<i64: 1, 16, 1>}, {transform_indices = @transform_3, window_bounds = array<i64: 1, 8, 1>}, {pipeline_mode = #tpu.pipeline_mode<synchronous>, transform_indices = @transform_4, window_bounds = array<i64: 32, 32>}, {pipeline_mode = #tpu.pipeline_mode<synchronous>, transform_indices = @transform_5, window_bounds = array<i64: 1, 32>}, {pipeline_mode = #tpu.pipeline_mode<synchronous>, transform_indices = @transform_6, window_bounds = array<i64: 32, 32>}, {pipeline_mode = #tpu.pipeline_mode<synchronous>, transform_indices = @transform_7, window_bounds = array<i64: 1, 32>}, {transform_indices = @transform_8, window_bounds = array<i64: 1, 16, 32>}, {transform_indices = @transform_9, window_bounds = array<i64: 1, 8, 32>}, {transform_indices = @transform_10, window_bounds = array<i64: 1, 8, 8, 16>}, {transform_indices = @transform_11, window_bounds = array<i64: 1, 8, 16, 8>}]} {
    %c0 = arith.constant 0 : index
    %c0_0 = arith.constant 0 : index
    %c0_1 = arith.constant 0 : index
    %0 = vector.load %arg1[%c0, %c0_0, %c0_1] : memref<1x16x32xf32, #tpu.memory_space<vmem>>, vector<1x16x32xf32>
    %1 = vector.shape_cast %0 : vector<1x16x32xf32> to vector<16x32xf32>
    %c0_2 = arith.constant 0 : index
    %c0_3 = arith.constant 0 : index
    %c0_4 = arith.constant 0 : index
    %2 = vector.load %arg2[%c0_2, %c0_3, %c0_4] : memref<1x8x32xf32, #tpu.memory_space<vmem>>, vector<1x8x32xf32>
    %3 = vector.shape_cast %2 : vector<1x8x32xf32> to vector<8x32xf32>
    %c0_5 = arith.constant 0 : index
    %c0_6 = arith.constant 0 : index
    %c0_7 = arith.constant 0 : index
    %4 = vector.load %arg3[%c0_5, %c0_6, %c0_7] : memref<1x16x1xf32, #tpu.memory_space<vmem>>, vector<1x16x1xf32>
    %5 = vector.shape_cast %4 : vector<1x16x1xf32> to vector<16x1xf32>
    %c0_8 = arith.constant 0 : index
    %c0_9 = arith.constant 0 : index
    %c0_10 = arith.constant 0 : index
    %6 = vector.load %arg4[%c0_8, %c0_9, %c0_10] : memref<1x8x1xf32, #tpu.memory_space<vmem>>, vector<1x8x1xf32>
    %7 = vector.shape_cast %6 : vector<1x8x1xf32> to vector<8x1xf32>
    %c0_11 = arith.constant 0 : index
    %c0_12 = arith.constant 0 : index
    %8 = vector.load %arg5[%c0_11, %c0_12] : memref<32x32xbf16, #tpu.memory_space<vmem>>, vector<32x32xbf16>
    %c0_13 = arith.constant 0 : index
    %c0_14 = arith.constant 0 : index
    %9 = vector.load %arg6[%c0_13, %c0_14] : memref<1x32xf32, #tpu.memory_space<vmem>>, vector<1x32xf32>
    %c0_15 = arith.constant 0 : index
    %c0_16 = arith.constant 0 : index
    %10 = vector.load %arg7[%c0_15, %c0_16] : memref<32x32xbf16, #tpu.memory_space<vmem>>, vector<32x32xbf16>
    %c0_17 = arith.constant 0 : index
    %c0_18 = arith.constant 0 : index
    %11 = vector.load %arg8[%c0_17, %c0_18] : memref<1x32xf32, #tpu.memory_space<vmem>>, vector<1x32xf32>
    %12 = arith.truncf %1 : vector<16x32xf32> to vector<16x32xbf16>
    %cst = arith.constant dense<0.000000e+00> : vector<16x32xf32>
    %13 = tpu.matmul %12, %8, %cst {dimension_numbers = #tpu.dot_dimension_numbers<[1], [0], [0], [1], [0, 0, 1, 1], [], []>} : vector<16x32xbf16>, vector<32x32xbf16>, vector<16x32xf32> -> vector<16x32xf32>
    %14 = vector.broadcast %9 : vector<1x32xf32> to vector<16x32xf32>
    %15 = arith.addf %13, %14 : vector<16x32xf32>
    %cst_19 = arith.constant dense<0.000000e+00> : vector<32xf32>
    %16 = vector.multi_reduction <add>, %15, %cst_19 [0] : vector<16x32xf32> to vector<32xf32>
    %17 = vector.shape_cast %16 : vector<32xf32> to vector<1x32xf32>
    %cst_20 = arith.constant 1.600000e+01 : f32
    %18 = vector.broadcast %cst_20 : f32 to vector<1x32xf32>
    %19 = arith.divf %17, %18 : vector<1x32xf32>
    %cst_21 = arith.constant dense<0.000000e+00> : vector<32xf32>
    %20 = vector.multi_reduction <add>, %3, %cst_21 [0] : vector<8x32xf32> to vector<32xf32>
    %21 = vector.shape_cast %20 : vector<32xf32> to vector<1x32xf32>
    %cst_22 = arith.constant 8.000000e+00 : f32
    %22 = vector.broadcast %cst_22 : f32 to vector<1x32xf32>
    %23 = arith.divf %21, %22 : vector<1x32xf32>
    %24 = vector.extract_strided_slice %15 {offsets = [0, 0], sizes = [16, 4], strides = [1, 1]} : vector<16x32xf32> to vector<16x4xf32>
    %25 = vector.extract_strided_slice %15 {offsets = [0, 4], sizes = [16, 4], strides = [1, 1]} : vector<16x32xf32> to vector<16x4xf32>
    %26 = vector.extract_strided_slice %15 {offsets = [0, 8], sizes = [16, 4], strides = [1, 1]} : vector<16x32xf32> to vector<16x4xf32>
    %27 = vector.extract_strided_slice %15 {offsets = [0, 12], sizes = [16, 4], strides = [1, 1]} : vector<16x32xf32> to vector<16x4xf32>
    %28 = vector.extract_strided_slice %15 {offsets = [0, 16], sizes = [16, 4], strides = [1, 1]} : vector<16x32xf32> to vector<16x4xf32>
    %29 = vector.extract_strided_slice %15 {offsets = [0, 20], sizes = [16, 4], strides = [1, 1]} : vector<16x32xf32> to vector<16x4xf32>
    %30 = vector.extract_strided_slice %15 {offsets = [0, 24], sizes = [16, 4], strides = [1, 1]} : vector<16x32xf32> to vector<16x4xf32>
    %31 = vector.extract_strided_slice %15 {offsets = [0, 28], sizes = [16, 4], strides = [1, 1]} : vector<16x32xf32> to vector<16x4xf32>
    %32 = vector.shape_cast %24 : vector<16x4xf32> to vector<1x16x4xf32>
    %33 = vector.shape_cast %25 : vector<16x4xf32> to vector<1x16x4xf32>
    %34 = vector.shape_cast %26 : vector<16x4xf32> to vector<1x16x4xf32>
    %35 = vector.shape_cast %27 : vector<16x4xf32> to vector<1x16x4xf32>
    %36 = vector.shape_cast %28 : vector<16x4xf32> to vector<1x16x4xf32>
    %37 = vector.shape_cast %29 : vector<16x4xf32> to vector<1x16x4xf32>
    %38 = vector.shape_cast %30 : vector<16x4xf32> to vector<1x16x4xf32>
    %39 = vector.shape_cast %31 : vector<16x4xf32> to vector<1x16x4xf32>
    %40 = tpu.concatenate %32, %33, %34, %35, %36, %37, %38, %39 in 0 : vector<1x16x4xf32>, vector<1x16x4xf32>, vector<1x16x4xf32>, vector<1x16x4xf32>, vector<1x16x4xf32>, vector<1x16x4xf32>, vector<1x16x4xf32>, vector<1x16x4xf32> -> vector<8x16x4xf32>
    %41 = arith.truncf %40 : vector<8x16x4xf32> to vector<8x16x4xbf16>
    %42 = vector.extract_strided_slice %3 {offsets = [0, 0], sizes = [8, 4], strides = [1, 1]} : vector<8x32xf32> to vector<8x4xf32>
    %43 = vector.extract_strided_slice %3 {offsets = [0, 4], sizes = [8, 4], strides = [1, 1]} : vector<8x32xf32> to vector<8x4xf32>
    %44 = vector.extract_strided_slice %3 {offsets = [0, 8], sizes = [8, 4], strides = [1, 1]} : vector<8x32xf32> to vector<8x4xf32>
    %45 = vector.extract_strided_slice %3 {offsets = [0, 12], sizes = [8, 4], strides = [1, 1]} : vector<8x32xf32> to vector<8x4xf32>
    %46 = vector.extract_strided_slice %3 {offsets = [0, 16], sizes = [8, 4], strides = [1, 1]} : vector<8x32xf32> to vector<8x4xf32>
    %47 = vector.extract_strided_slice %3 {offsets = [0, 20], sizes = [8, 4], strides = [1, 1]} : vector<8x32xf32> to vector<8x4xf32>
    %48 = vector.extract_strided_slice %3 {offsets = [0, 24], sizes = [8, 4], strides = [1, 1]} : vector<8x32xf32> to vector<8x4xf32>
    %49 = vector.extract_strided_slice %3 {offsets = [0, 28], sizes = [8, 4], strides = [1, 1]} : vector<8x32xf32> to vector<8x4xf32>
    %50 = vector.shape_cast %42 : vector<8x4xf32> to vector<1x8x4xf32>
    %51 = vector.shape_cast %43 : vector<8x4xf32> to vector<1x8x4xf32>
    %52 = vector.shape_cast %44 : vector<8x4xf32> to vector<1x8x4xf32>
    %53 = vector.shape_cast %45 : vector<8x4xf32> to vector<1x8x4xf32>
    %54 = vector.shape_cast %46 : vector<8x4xf32> to vector<1x8x4xf32>
    %55 = vector.shape_cast %47 : vector<8x4xf32> to vector<1x8x4xf32>
    %56 = vector.shape_cast %48 : vector<8x4xf32> to vector<1x8x4xf32>
    %57 = vector.shape_cast %49 : vector<8x4xf32> to vector<1x8x4xf32>
    %58 = tpu.concatenate %50, %51, %52, %53, %54, %55, %56, %57 in 0 : vector<1x8x4xf32>, vector<1x8x4xf32>, vector<1x8x4xf32>, vector<1x8x4xf32>, vector<1x8x4xf32>, vector<1x8x4xf32>, vector<1x8x4xf32>, vector<1x8x4xf32> -> vector<8x8x4xf32>
    %59 = arith.truncf %58 : vector<8x8x4xf32> to vector<8x8x4xbf16>
    "tpu.trace_start"() <{level = 10 : i32, message = "hid,hjd->hij"}> : () -> ()
    %cst_23 = arith.constant dense<0.000000e+00> : vector<8x16x8xf32>
    %60 = tpu.matmul %41, %59, %cst_23 {dimension_numbers = #tpu.dot_dimension_numbers<[2], [2], [1], [1], [0, 0, 0, 1, 1, 1], [0], [0]>} : vector<8x16x4xbf16>, vector<8x8x4xbf16>, vector<8x16x8xf32> -> vector<8x16x8xf32>
    "tpu.trace_stop"() : () -> ()
    %cst_24 = arith.constant 5.000000e-01 : f32
    %61 = vector.broadcast %cst_24 : f32 to vector<8x16x8xf32>
    %62 = arith.mulf %60, %61 : vector<8x16x8xf32>
    "tpu.trace_start"() <{level = 10 : i32, message = "hjd,hid->hji"}> : () -> ()
    %cst_25 = arith.constant dense<0.000000e+00> : vector<8x8x16xf32>
    %63 = tpu.matmul %59, %41, %cst_25 {dimension_numbers = #tpu.dot_dimension_numbers<[2], [2], [1], [1], [0, 0, 0, 1, 1, 1], [0], [0]>} : vector<8x8x4xbf16>, vector<8x16x4xbf16>, vector<8x8x16xf32> -> vector<8x8x16xf32>
    "tpu.trace_stop"() : () -> ()
    %cst_26 = arith.constant 5.000000e-01 : f32
    %64 = vector.broadcast %cst_26 : f32 to vector<8x8x16xf32>
    %65 = arith.mulf %63, %64 : vector<8x8x16xf32>
    %66 = vector.shape_cast %7 : vector<8x1xf32> to vector<1x8x1xf32>
    %67 = vector.broadcast %66 : vector<1x8x1xf32> to vector<8x8x16xf32>
    %68 = arith.addf %65, %67 : vector<8x8x16xf32>
    %cst_27 = arith.constant dense<0xFF800000> : vector<8x16xf32>
    %69 = vector.multi_reduction <maximumf>, %68, %cst_27 [1] : vector<8x8x16xf32> to vector<8x16xf32>
    %70 = vector.shape_cast %69 : vector<8x16xf32> to vector<8x1x16xf32>
    %71 = vector.broadcast %70 : vector<8x1x16xf32> to vector<8x8x16xf32>
    %72 = arith.subf %68, %71 : vector<8x8x16xf32>
    %73 = math.exp %72 : vector<8x8x16xf32>
    %cst_28 = arith.constant dense<0.000000e+00> : vector<8x16xf32>
    %74 = vector.multi_reduction <add>, %73, %cst_28 [1] : vector<8x8x16xf32> to vector<8x16xf32>
    %75 = vector.shape_cast %74 : vector<8x16xf32> to vector<8x1x16xf32>
    %76 = tpu.reciprocal %75 {approx = true} : vector<8x1x16xf32> -> vector<8x1x16xf32>
    %77 = vector.broadcast %76 : vector<8x1x16xf32> to vector<8x8x16xf32>
    %78 = arith.mulf %73, %77 : vector<8x8x16xf32>
    %c0_29 = arith.constant 0 : index
    %c0_30 = arith.constant 0 : index
    %c0_31 = arith.constant 0 : index
    %c0_32 = arith.constant 0 : index
    %79 = vector.load %arg11[%c0_29, %c0_30, %c0_31, %c0_32] : memref<1x8x8x16xf32, #tpu.memory_space<vmem>>, vector<1x8x8x16xf32>
    %80 = vector.shape_cast %79 : vector<1x8x8x16xf32> to vector<8x8x16xf32>
    %81 = vector.shape_cast %78 : vector<8x8x16xf32> to vector<1x8x8x16xf32>
    tpu.vector_store %arg11[%c0_29, %c0_30, %c0_31, %c0_32], %81 {strides = array<i32>} : memref<1x8x8x16xf32, #tpu.memory_space<vmem>>, vector<1x8x8x16xf32>,
    %82 = vector.shape_cast %5 : vector<16x1xf32> to vector<1x16x1xf32>
    %83 = vector.broadcast %82 : vector<1x16x1xf32> to vector<8x16x8xf32>
    %84 = arith.addf %62, %83 : vector<8x16x8xf32>
    %cst_33 = arith.constant dense<0xFF800000> : vector<8x8xf32>
    %85 = vector.multi_reduction <maximumf>, %84, %cst_33 [1] : vector<8x16x8xf32> to vector<8x8xf32>
    %86 = vector.shape_cast %85 : vector<8x8xf32> to vector<8x1x8xf32>
    %87 = vector.broadcast %86 : vector<8x1x8xf32> to vector<8x16x8xf32>
    %88 = arith.subf %84, %87 : vector<8x16x8xf32>
    %89 = math.exp %88 : vector<8x16x8xf32>
    %cst_34 = arith.constant dense<0.000000e+00> : vector<8x8xf32>
    %90 = vector.multi_reduction <add>, %89, %cst_34 [1] : vector<8x16x8xf32> to vector<8x8xf32>
    %91 = vector.shape_cast %90 : vector<8x8xf32> to vector<8x1x8xf32>
    %92 = tpu.reciprocal %91 {approx = true} : vector<8x1x8xf32> -> vector<8x1x8xf32>
    %93 = vector.broadcast %92 : vector<8x1x8xf32> to vector<8x16x8xf32>
    %94 = arith.mulf %89, %93 : vector<8x16x8xf32>
    %c0_35 = arith.constant 0 : index
    %c0_36 = arith.constant 0 : index
    %c0_37 = arith.constant 0 : index
    %c0_38 = arith.constant 0 : index
    %95 = vector.load %arg12[%c0_35, %c0_36, %c0_37, %c0_38] : memref<1x8x16x8xf32, #tpu.memory_space<vmem>>, vector<1x8x16x8xf32>
    %96 = vector.shape_cast %95 : vector<1x8x16x8xf32> to vector<8x16x8xf32>
    %97 = vector.shape_cast %94 : vector<8x16x8xf32> to vector<1x8x16x8xf32>
    tpu.vector_store %arg12[%c0_35, %c0_36, %c0_37, %c0_38], %97 {strides = array<i32>} : memref<1x8x16x8xf32, #tpu.memory_space<vmem>>, vector<1x8x16x8xf32>,
    %98 = arith.truncf %78 : vector<8x8x16xf32> to vector<8x8x16xbf16>
    "tpu.trace_start"() <{level = 10 : i32, message = "hji,hid->hjd"}> : () -> ()
    %cst_39 = arith.constant dense<0.000000e+00> : vector<8x8x4xf32>
    %99 = tpu.matmul %98, %41, %cst_39 {dimension_numbers = #tpu.dot_dimension_numbers<[2], [1], [1], [2], [0, 0, 0, 1, 1, 2], [0], [0]>} : vector<8x8x16xbf16>, vector<8x16x4xbf16>, vector<8x8x4xf32> -> vector<8x8x4xf32>
    "tpu.trace_stop"() : () -> ()
    %100 = arith.truncf %94 : vector<8x16x8xf32> to vector<8x16x8xbf16>
    "tpu.trace_start"() <{level = 10 : i32, message = "hij,hjd->hid"}> : () -> ()
    %cst_40 = arith.constant dense<0.000000e+00> : vector<8x16x4xf32>
    %101 = tpu.matmul %100, %59, %cst_40 {dimension_numbers = #tpu.dot_dimension_numbers<[2], [1], [1], [2], [0, 0, 0, 1, 1, 2], [0], [0]>} : vector<8x16x8xbf16>, vector<8x8x4xbf16>, vector<8x16x4xf32> -> vector<8x16x4xf32>
    "tpu.trace_stop"() : () -> ()
    %102 = vector.extract_strided_slice %101 {offsets = [0, 0, 0], sizes = [1, 16, 4], strides = [1, 1, 1]} : vector<8x16x4xf32> to vector<1x16x4xf32>
    %103 = vector.shape_cast %102 : vector<1x16x4xf32> to vector<16x4xf32>
    %104 = vector.extract_strided_slice %101 {offsets = [1, 0, 0], sizes = [1, 16, 4], strides = [1, 1, 1]} : vector<8x16x4xf32> to vector<1x16x4xf32>
    %105 = vector.shape_cast %104 : vector<1x16x4xf32> to vector<16x4xf32>
    %106 = vector.extract_strided_slice %101 {offsets = [2, 0, 0], sizes = [1, 16, 4], strides = [1, 1, 1]} : vector<8x16x4xf32> to vector<1x16x4xf32>
    %107 = vector.shape_cast %106 : vector<1x16x4xf32> to vector<16x4xf32>
    %108 = vector.extract_strided_slice %101 {offsets = [3, 0, 0], sizes = [1, 16, 4], strides = [1, 1, 1]} : vector<8x16x4xf32> to vector<1x16x4xf32>
    %109 = vector.shape_cast %108 : vector<1x16x4xf32> to vector<16x4xf32>
    %110 = vector.extract_strided_slice %101 {offsets = [4, 0, 0], sizes = [1, 16, 4], strides = [1, 1, 1]} : vector<8x16x4xf32> to vector<1x16x4xf32>
    %111 = vector.shape_cast %110 : vector<1x16x4xf32> to vector<16x4xf32>
    %112 = vector.extract_strided_slice %101 {offsets = [5, 0, 0], sizes = [1, 16, 4], strides = [1, 1, 1]} : vector<8x16x4xf32> to vector<1x16x4xf32>
    %113 = vector.shape_cast %112 : vector<1x16x4xf32> to vector<16x4xf32>
    %114 = vector.extract_strided_slice %101 {offsets = [6, 0, 0], sizes = [1, 16, 4], strides = [1, 1, 1]} : vector<8x16x4xf32> to vector<1x16x4xf32>
    %115 = vector.shape_cast %114 : vector<1x16x4xf32> to vector<16x4xf32>
    %116 = vector.extract_strided_slice %101 {offsets = [7, 0, 0], sizes = [1, 16, 4], strides = [1, 1, 1]} : vector<8x16x4xf32> to vector<1x16x4xf32>
    %117 = vector.shape_cast %116 : vector<1x16x4xf32> to vector<16x4xf32>
    %118 = tpu.concatenate %103, %105, %107, %109, %111, %113, %115, %117 in 1 : vector<16x4xf32>, vector<16x4xf32>, vector<16x4xf32>, vector<16x4xf32>, vector<16x4xf32>, vector<16x4xf32>, vector<16x4xf32>, vector<16x4xf32> -> vector<16x32xf32>
    %119 = vector.broadcast %19 : vector<1x32xf32> to vector<16x32xf32>
    %120 = arith.mulf %118, %119 : vector<16x32xf32>
    %121 = vector.extract_strided_slice %99 {offsets = [0, 0, 0], sizes = [1, 8, 4], strides = [1, 1, 1]} : vector<8x8x4xf32> to vector<1x8x4xf32>
    %122 = vector.shape_cast %121 : vector<1x8x4xf32> to vector<8x4xf32>
    %123 = vector.extract_strided_slice %99 {offsets = [1, 0, 0], sizes = [1, 8, 4], strides = [1, 1, 1]} : vector<8x8x4xf32> to vector<1x8x4xf32>
    %124 = vector.shape_cast %123 : vector<1x8x4xf32> to vector<8x4xf32>
    %125 = vector.extract_strided_slice %99 {offsets = [2, 0, 0], sizes = [1, 8, 4], strides = [1, 1, 1]} : vector<8x8x4xf32> to vector<1x8x4xf32>
    %126 = vector.shape_cast %125 : vector<1x8x4xf32> to vector<8x4xf32>
    %127 = vector.extract_strided_slice %99 {offsets = [3, 0, 0], sizes = [1, 8, 4], strides = [1, 1, 1]} : vector<8x8x4xf32> to vector<1x8x4xf32>
    %128 = vector.shape_cast %127 : vector<1x8x4xf32> to vector<8x4xf32>
    %129 = vector.extract_strided_slice %99 {offsets = [4, 0, 0], sizes = [1, 8, 4], strides = [1, 1, 1]} : vector<8x8x4xf32> to vector<1x8x4xf32>
    %130 = vector.shape_cast %129 : vector<1x8x4xf32> to vector<8x4xf32>
    %131 = vector.extract_strided_slice %99 {offsets = [5, 0, 0], sizes = [1, 8, 4], strides = [1, 1, 1]} : vector<8x8x4xf32> to vector<1x8x4xf32>
    %132 = vector.shape_cast %131 : vector<1x8x4xf32> to vector<8x4xf32>
    %133 = vector.extract_strided_slice %99 {offsets = [6, 0, 0], sizes = [1, 8, 4], strides = [1, 1, 1]} : vector<8x8x4xf32> to vector<1x8x4xf32>
    %134 = vector.shape_cast %133 : vector<1x8x4xf32> to vector<8x4xf32>
    %135 = vector.extract_strided_slice %99 {offsets = [7, 0, 0], sizes = [1, 8, 4], strides = [1, 1, 1]} : vector<8x8x4xf32> to vector<1x8x4xf32>
    %136 = vector.shape_cast %135 : vector<1x8x4xf32> to vector<8x4xf32>
    %137 = tpu.concatenate %122, %124, %126, %128, %130, %132, %134, %136 in 1 : vector<8x4xf32>, vector<8x4xf32>, vector<8x4xf32>, vector<8x4xf32>, vector<8x4xf32>, vector<8x4xf32>, vector<8x4xf32>, vector<8x4xf32> -> vector<8x32xf32>
    %138 = vector.broadcast %23 : vector<1x32xf32> to vector<8x32xf32>
    %139 = arith.mulf %137, %138 : vector<8x32xf32>
    %140 = arith.truncf %120 : vector<16x32xf32> to vector<16x32xbf16>
    %cst_41 = arith.constant dense<0.000000e+00> : vector<16x32xf32>
    %141 = tpu.matmul %140, %10, %cst_41 {dimension_numbers = #tpu.dot_dimension_numbers<[1], [0], [0], [1], [0, 0, 1, 1], [], []>} : vector<16x32xbf16>, vector<32x32xbf16>, vector<16x32xf32> -> vector<16x32xf32>
    %142 = vector.broadcast %11 : vector<1x32xf32> to vector<16x32xf32>
    %143 = arith.addf %141, %142 : vector<16x32xf32>
    %144 = arith.negf %143 : vector<16x32xf32>
    %145 = math.exp %144 : vector<16x32xf32>
    %cst_42 = arith.constant 1.000000e+00 : f32
    %146 = vector.broadcast %cst_42 : f32 to vector<16x32xf32>
    %147 = arith.addf %146, %145 : vector<16x32xf32>
    %148 = arith.divf %146, %147 : vector<16x32xf32>
    %149 = arith.mulf %1, %148 : vector<16x32xf32>
    %c0_43 = arith.constant 0 : index
    %c0_44 = arith.constant 0 : index
    %c0_45 = arith.constant 0 : index
    %150 = vector.load %arg9[%c0_43, %c0_44, %c0_45] : memref<1x16x32xf32, #tpu.memory_space<vmem>>, vector<1x16x32xf32>
    %151 = vector.shape_cast %150 : vector<1x16x32xf32> to vector<16x32xf32>
    %152 = vector.shape_cast %149 : vector<16x32xf32> to vector<1x16x32xf32>
    tpu.vector_store %arg9[%c0_43, %c0_44, %c0_45], %152 {strides = array<i32>} : memref<1x16x32xf32, #tpu.memory_space<vmem>>, vector<1x16x32xf32>,
    %153 = arith.negf %139 : vector<8x32xf32>
    %154 = math.exp %153 : vector<8x32xf32>
    %cst_46 = arith.constant 1.000000e+00 : f32
    %155 = vector.broadcast %cst_46 : f32 to vector<8x32xf32>
    %156 = arith.addf %155, %154 : vector<8x32xf32>
    %157 = arith.divf %155, %156 : vector<8x32xf32>
    %158 = arith.mulf %3, %157 : vector<8x32xf32>
    %c0_47 = arith.constant 0 : index
    %c0_48 = arith.constant 0 : index
    %c0_49 = arith.constant 0 : index
    %159 = vector.load %arg10[%c0_47, %c0_48, %c0_49] : memref<1x8x32xf32, #tpu.memory_space<vmem>>, vector<1x8x32xf32>
    %160 = vector.shape_cast %159 : vector<1x8x32xf32> to vector<8x32xf32>
    %161 = vector.shape_cast %158 : vector<8x32xf32> to vector<1x8x32xf32>
    tpu.vector_store %arg10[%c0_47, %c0_48, %c0_49], %161 {strides = array<i32>} : memref<1x8x32xf32, #tpu.memory_space<vmem>>, vector<1x8x32xf32>,
    return
  }
  func.func @transform_0(%arg0: i32) -> (i32, i32, i32) {
    %c0_i32 = arith.constant 0 : i32
    %c0_i32_0 = arith.constant 0 : i32
    %c0_i32_1 = arith.constant 0 : i32
    return %arg0, %c0_i32, %c0_i32_0 : i32, i32, i32
  }
  func.func @transform_1(%arg0: i32) -> (i32, i32, i32) {
    %c0_i32 = arith.constant 0 : i32
    %c0_i32_0 = arith.constant 0 : i32
    %c0_i32_1 = arith.constant 0 : i32
    return %arg0, %c0_i32, %c0_i32_0 : i32, i32, i32
  }
  func.func @transform_2(%arg0: i32) -> (i32, i32, i32) {
    %c0_i32 = arith.constant 0 : i32
    %c0_i32_0 = arith.constant 0 : i32
    %c0_i32_1 = arith.constant 0 : i32
    return %arg0, %c0_i32, %c0_i32_0 : i32, i32, i32
  }
  func.func @transform_3(%arg0: i32) -> (i32, i32, i32) {
    %c0_i32 = arith.constant 0 : i32
    %c0_i32_0 = arith.constant 0 : i32
    %c0_i32_1 = arith.constant 0 : i32
    return %arg0, %c0_i32, %c0_i32_0 : i32, i32, i32
  }
  func.func @transform_4(%arg0: i32) -> (i32, i32) {
    %c0_i32 = arith.constant 0 : i32
    %c0_i32_0 = arith.constant 0 : i32
    %c0_i32_1 = arith.constant 0 : i32
    return %c0_i32, %c0_i32_0 : i32, i32
  }
  func.func @transform_5(%arg0: i32) -> (i32, i32) {
    %c0_i32 = arith.constant 0 : i32
    %c0_i32_0 = arith.constant 0 : i32
    %c0_i32_1 = arith.constant 0 : i32
    return %c0_i32, %c0_i32_0 : i32, i32
  }
  func.func @transform_6(%arg0: i32) -> (i32, i32) {
    %c0_i32 = arith.constant 0 : i32
    %c0_i32_0 = arith.constant 0 : i32
    %c0_i32_1 = arith.constant 0 : i32
    return %c0_i32, %c0_i32_0 : i32, i32
  }
  func.func @transform_7(%arg0: i32) -> (i32, i32) {
    %c0_i32 = arith.constant 0 : i32
    %c0_i32_0 = arith.constant 0 : i32
    %c0_i32_1 = arith.constant 0 : i32
    return %c0_i32, %c0_i32_0 : i32, i32
  }
  func.func @transform_8(%arg0: i32) -> (i32, i32, i32) {
    %c0_i32 = arith.constant 0 : i32
    %c0_i32_0 = arith.constant 0 : i32
    %c0_i32_1 = arith.constant 0 : i32
    return %arg0, %c0_i32, %c0_i32_0 : i32, i32, i32
  }
  func.func @transform_9(%arg0: i32) -> (i32, i32, i32) {
    %c0_i32 = arith.constant 0 : i32
    %c0_i32_0 = arith.constant 0 : i32
    %c0_i32_1 = arith.constant 0 : i32
    return %arg0, %c0_i32, %c0_i32_0 : i32, i32, i32
  }
  func.func @transform_10(%arg0: i32) -> (i32, i32, i32, i32) {
    %c0_i32 = arith.constant 0 : i32
    %c0_i32_0 = arith.constant 0 : i32
    %c0_i32_1 = arith.constant 0 : i32
    %c0_i32_2 = arith.constant 0 : i32
    return %arg0, %c0_i32, %c0_i32_0, %c0_i32_1 : i32, i32, i32, i32
  }
  func.func @transform_11(%arg0: i32) -> (i32, i32, i32, i32) {
    %c0_i32 = arith.constant 0 : i32
    %c0_i32_0 = arith.constant 0 : i32
    %c0_i32_1 = arith.constant 0 : i32
    %c0_i32_2 = arith.constant 0 : i32
    return %arg0, %c0_i32, %c0_i32_0, %c0_i32_1 : i32, i32, i32, i32
  }
}

</mosaic_0001>

<bundles_post_ra>
// kernel: tpu_custom_call.1
= control target key start
LH: loop header
LB: loop body
LE: loop exit
PB: predicated region body
PF: predicated region fallthrough
CT: control target
= control target key end

     0   :  { %s4858_s0 = inlined_call_operand.vmem [shape: f32[2,16,32], index: 0, kind: input, shape index: {}]   ;;  %s4859_s1 = inlined_call_operand.vmem [shape: f32[2,8,32], index: 1, kind: input, shape index: {}]   ;;  %s4860_s2 = inlined_call_operand.vmem [shape: f32[2,16,1], index: 2, kind: input, shape index: {}]   ;;  %s4861_s3 = inlined_call_operand.vmem [shape: f32[2,8,1], index: 3, kind: input, shape index: {}]   ;;  %s4862_s4 = inlined_call_operand.hbm [shape: bf16[32,32], index: 4, kind: input, shape index: {}]   ;;  %s4863_s5 = inlined_call_operand.vmem [shape: f32[1,32], index: 5, kind: input, shape index: {}]   ;;  %s4864_s6 = inlined_call_operand.hbm [shape: bf16[32,32], index: 6, kind: input, shape index: {}]   ;;  %s4865_s7 = inlined_call_operand.vmem [shape: f32[1,32], index: 7, kind: input, shape index: {}]   ;;  %s4866_s8 = inlined_call_operand.hbm [shape: f32[2,16,32], index: 8, kind: output, shape index: {0}]   ;;  %s4867_s9 = inlined_call_operand.hbm [shape: f32[2,8,32], index: 9, kind: output, shape index: {1}]   ;;  %s4868_s10 = inlined_call_operand.hbm [shape: f32[2,8,8,16], index: 10, kind: output, shape index: {2}]   ;;  %s4869_s11 = inlined_call_operand.vmem [shape: f32[2,8,16,8], index: 11, kind: output, shape index: {3}]  }
   0x1   :  { %4882 = sst [smem:[#allocation21_spill]] %s4858_s0 }
   0x2   :  { %4883 = sst [smem:[#allocation22_spill]] %s4859_s1 }
   0x3   :  { %4884 = sst [smem:[#allocation23_spill]] %s4860_s2 }
   0x4   :  { %4885 = sst [smem:[#allocation24_spill]] %s4861_s3 }
   0x5   :  { %4886 = sst [smem:[#allocation25_spill]] %s4862_s4 }
   0x6   :  { %17 = vsyncpa [#allocation3], 0 }
   0x7   :  { %18 = vsyncpa [#allocation6], 0 }
   0x8   :  { %19 = vsyncpa [#allocation4], 0 }
   0x9   :  { %21 = vsyncpa [#allocation4 + $0x1], 0 }
   0xa   :  { %22 = vsyncpa [#allocation9], 0 }
   0xb   :  { %24 = vsyncpa [#allocation9 + $0x1], 0  ;;  %s3875_s17 = smov 0   ;;  %s3877_s18 = smov 0  }
   0xc   :  { %s3879_s19 = smov 0   ;;  %s3881_s20 = smov 0  }
   0xd LB: > { %s3896_s21 = sadd.s32 4294967295, %s3788_s20   ;;  %s4870_s22 = sadd.s32 4294967294, %s3788_s20   ;;  %s3788_s20 = sphi %s3881_s20, %s4921_s20   ;;  %s3784_s19 = sphi %s3879_s19, %s4920_s19   ;;  %s3780_s18 = sphi %s3877_s18, %s4919_s18   ;;  %s3776_s17 = sphi %s3875_s17, %s4918_s17  }
   0xe   : > { %s3900_s23 = sadd.s32 1, %s3788_s20   ;;  %s225_s24 = sadd.s32 1, %s3784_s19 }
   0xf   : > { %s222_s25 = ssub.s32 %s3788_s20, %s3900_s23  ;;  %p235_p0 = scmp.ne.s32.totalorder %s3784_s19, %s3780_s18 }
  0x10   : > { %p223_p1 = scmp.eq.s32.totalorder %s222_s25, 0  ;;  %p236_p2 = scmp.eq.s32.totalorder %s3896_s21, 1 }
  0x11   : > { %p241_p3 = scmp.ne.s32.totalorder %s3780_s18, %s3776_s17  ;;  %p242_p4 = scmp.eq.s32.totalorder %s4870_s22, 1 }
  0x12   : > { %s3913_s26 = scalar_select %p223_p1, %s3784_s19, %s225_s24  }
  0x13   : > { %p3915_p5 = por %p236_p2, %p235_p0  ;;  %p3919_p6 = por %p242_p4, %p241_p3 }
  0x14   : > { %4887 = sst [smem:[#allocation15_spill]] %s3913_s26  ;;  %p3032_p7 = scmp.ge.s32.totalorder %s3788_s20, 1 }
  0x15   : > { %s4889_s28 = scalar_select %p3919_p6, 1, 0 }
  0x16   : > { %p327_p8 = scmp.lt.s32.totalorder %s3788_s20, 3  ;;  %p4871_p9 = scmp.eq.s32.totalorder %s3896_s21, 0 }
  0x17   : > { %s3790_s30 = smov [#allocation2]   ;;  %s3791_s14 = smov [#allocation5]  }
  0x18   : > { %p3926_p10 = pnand %p3032_p7, %p327_p8  ;;  %s339_s12 = sshll.u32 %s3790_s30, 4  ;;  %s340_s12 = int_to_ptr.vmem [resolvable:$true] %s339_s12 }
  0x19   : > { %s355_s15 = sshll.u32 %s3791_s14, 4  ;;  %s3623_s16 = scalar_lea.vmem %s340_s12, 256  ;;  %s356_s15 = int_to_ptr.vmem [resolvable:$true] %s355_s15 }
  0x1a   : > { %p3400_p11 = pneg %p3926_p10  ;;  %p3624_p0 = scmp.ne.s32.totalorder %s340_s12, %s3623_s16 }
  0x1b   : > { %p3631_p3 = scmp.lt.s32.totalorder %s340_s12, %s340_s12  ;;  %p3632_p4 = scmp.lt.s32.totalorder %s3623_s16, %s3623_s16 }
  0x1c   : > { %p3934_p12 = pnand %p4871_p9, %p3400_p11 }
  0x1d   : > { %p3633_p7 = por %p3632_p4, %p3631_p3 }
  0x1e   : > { %p3614_p13 = pneg %p3934_p12 }
  0x20   : > { %p3626_p1 = pnand %p3624_p0, %p3614_p13 }
  0x22   : > { %p3627_p2 = pneg %p3626_p1 }
  0x24   : > { %p3634_p8 = pnand %p3633_p7, %p3627_p2 }
  0x26   : > { %3637 = shalt.err (!%p3634_p8)
}
  0x27   : > { %s3792_s24 = smov 64   ;;  %s3793_s25 = smov 4  }
  0x28   : > { %s4892_s4 = sld [smem:[#allocation25_spill]]  ;;  %s3649_s22 = scalar_lea.vmem %s356_s15, 256 }
  0x29   : > { %p3650_p11 = scmp.ne.s32.totalorder %s356_s15, %s3649_s22  ;;  %p3657_p9 = scmp.lt.s32.totalorder %s356_s15, %s356_s15 }
  0x2a   : > { %p3658_p6 = scmp.lt.s32.totalorder %s3649_s22, %s3649_s22 }
  0x2b   : > { %p3652_p0 = pnand %p3650_p11, %p3614_p13 }
  0x2c   : > { %p3659_p3 = por %p3658_p6, %p3657_p9 }
  0x2d   : > { %p3653_p1 = pneg %p3652_p0 }
  0x2e   : > { %3403 = dma.hbm_to_vmem [thread:$0]  (!%p3934_p12), %s4892_s4, 256, %s340_s12, [#allocation3], %s3792_s24, %s3792_s24, %s3793_s25  }
  0x2f   : > { %p3660_p2 = pnand %p3659_p3, %p3653_p1 }
  0x31   : > { %3663 = shalt.err (!%p3660_p2)
}
  0x32   : > { %3406 = dma.hbm_to_vmem [thread:$0]  (!%p3934_p12), %s4864_s6, 256, %s356_s15, [#allocation6], %s3792_s24, %s3792_s24, %s3793_s25  }
  0x33   : > { %404 = sbr.rel (%p3926_p10) target bundleno = 1327 (0x52f), region = 52 }
  0x38   : > { %p4893_p4 = scmp.eq.s32.totalorder %s3896_s21, 0 }
  0x3a   : > { %3759 = dma.done.wait (%p4893_p4), [#allocation3], 256   ;;  %p4894_p13 = pmov %p4893_p4 }
  0x3b   : > { %p4895_p7 = pmov %p4893_p4 }
  0x3c   : > { %3761 = vsyncadd (%p4894_p13), [#allocation3], 4294967040 }
  0x3d   : > { %3763 = dma.done.wait (%p4895_p7), [#allocation6], 256   ;;  %p4896_p6 = pmov %p4893_p4 }
  0x3e   : > { %p476_p9 = scmp.lt.s32.totalorder %s3896_s21, 1  ;;  %v4873_v0 = vmov 0.0   ;;  %vm3795_vm0 = vmmov 0   ;;  %s4897_s0 = sld [smem:[#allocation21_spill]]  ;;  %v3513_v1 = vld [vmem:[#allocation2 + $0x8] sm:$0xff]   ;;  %v3514_v2 = vld [vmem:[#allocation2] sm:$0xff]  }
  0x3f   : > { %3765 = vsyncadd (%p4896_p6), [#allocation6], 4294967040  ;;  %3178 = vmatprep.subr.bf16.mxu0 %v4873_v0  ;;  %3182 = vmatprep.mubr.msk.bf16.mxu0 %vm3795_vm0, %v4873_v0  ;;  %vm535_vm1 = vcmask 261120   ;;  %s4898_s1 = sld [smem:[#allocation22_spill]]  ;;  %vm682_vm2 = vcmask 31744   ;;  %v3796_v9 = vmov 0  }
  0x40   : > { %s3971_s22 = scalar_select %p476_p9, %s3896_s21, 1  ;;  %3186 = vmatprep.subr.bf16.mxu1 %v4873_v0  ;;  %3188 = vmatprep.mubr.msk.bf16.mxu1 %vm3795_vm0, %v4873_v0  ;;  %v3050_v10 = vld [vmem:[%s4863_s5] ss:$0 sm:$0xff]  ;;  %vm1603_vm3 = vcmask 64512   ;;  %vm1416_vm4 = vcmask 130048   ;;  %vm2199_vm5 = vcmask 1043456  }
  0x41   : > { %3179 = vmatpush3.bf16.msra.mxu0 %v3513_v1  ;;  %3512 = vset.pattern.permute.xlu1 %v3796_v9  ;;  %s3797_s29 = smov 116   ;;  %s3798_s12 = smov 124   ;;  %vm2625_vm6 = vcmask 97280   ;;  %vm2630_vm7 = vcmask 162816   ;;  %vm2633_vm8 = vcmask 195584   ;;  %vm2636_vm9 = vcmask 228352  }
  0x42   : > { %s3103_s26 = sshll.u32 %s3971_s22, 4  ;;  %3180 = vmatprep.subr.bf16.mxu0 %v4873_v0  ;;  %s4872_s15 = sshll.u32 %s3971_s22, 3  ;;  %3511 = vset.pattern.permute.xlu0 %v3796_v9 }
  0x43   : > { %s3799_s24 = smov 120   ;;  %s3800_s25 = smov 112  }
  0x44   : > { %s3982_s13 = scalar_lea.vmem %s4897_s0, %s3103_s26  ;;  %s3801_s14 = smov 108  }
  0x45   : > { %v500_v3 = vld [vmem:[%s3982_s13] sm:$0xff]  ;;  %v501_v4 = vld [vmem:[%s3982_s13 + $0x8] sm:$0xff]  ;;  %3181 = vmatpush3.bf16.msra.mxu0 %v3514_v2  ;;  %s3997_s30 = scalar_lea.vmem %s4898_s1, %s4872_s15  ;;  %s3802_s16 = smov 104  }
  0x46   : > { %v516_v5 = vpack.c.bf16 %v501_v4, %v500_v3  ;;  %3192 = vmatprep.subr.bf16.mxu0 %v4873_v0  ;;  %v502_v6 = vld [vmem:[%s3997_s30] sm:$0xff]  ;;  %s4900_s2 = sld [smem:[#allocation23_spill]]  ;;  %s3105_s0 = sshll.u32 %s3971_s22, 7 }
  0x47   : > { %v4000_v7 = vpack.c.bf16 %v502_v6, %v502_v6  ;;  %s4902_s3 = sld [smem:[#allocation24_spill]] }
  0x48   : > { %3183 = vmatmul.mubr.msk.bf16.vlgmr.msra.gmra.mxu0 %vm535_vm1, %v516_v5 }
  0x49   : > { %3194 = vmatprep.mubr.msk.bf16.mxu0 %vm3795_vm0, %v4873_v0  ;;  %v687_v8 = vsel %vm682_vm2, %v4000_v7, 0 }
  0x4a   : > { %3187 = vmatpush3.bf16.xpose.msra.mxu1 %v687_v8 }
  0x4b   : > { %3198 = vmatprep.subr.bf16.mxu1 %v4873_v0 }
  0x4c   : > { %s489_s1 = scalar_lea.vmem %s4900_s2, %s3103_s26  ;;  %s4179_s26 = scalar_lea.vmem %s4869_s11, %s3105_s0 }
  0x4d   : > { %v503_v23 = vld [vmem:[%s489_s1] sm:$0xff]  ;;  %v504_v24 = vld [vmem:[%s489_s1 + $0x8] sm:$0xff]  ;;  %s3809_s0 = smov 24   ;;  %s3810_s1 = smov 28  }
 0x108   : > { %v573_v11 = vpop.f32.mrf.mxu0 }
 0x109   : > { %v574_v12 = vadd.f32 %v3050_v10, %v573_v11 }
 0x10a   : > { %v3184_v13 = vpop.f32.mrf.mxu0 }
 0x10b   : > { %v3486_v14 = vpack.i.bf16 %v574_v12, %v502_v6  ;;  %v580_v19 = vsel %vm535_vm1, %v574_v12, 0.0 }
 0x10c   : > { %v576_v15 = vpop.f32.mrf.mxu0 }
 0x10d   : > { %v577_v16 = vadd.f32 %v3050_v10, %v576_v15  ;;  %3487 = vrot.lane.b32.xlu1 %v3486_v14, %s3797_s29  ;;  %3477 = vrot.lane.b32.xlu0 %v3486_v14, %s3798_s12 }
 0x10e   : > { %v3185_v17 = vpop.f32.mrf.mxu0 }
 0x10f   : > { %v4008_v18 = vpack.c.bf16 %v577_v16, %v574_v12  ;;  %v581_v20 = vsel %vm535_vm1, %v577_v16, 0.0  ;;  %v3496_v22 = vpack.i.bf16 %v577_v16, %v574_v12 }
 0x110   : > { %v4012_v21 = vadd.f32 %v581_v20, %v580_v19 }
 0x111   : > { %3482 = vrot.lane.b32.xlu0 %v3486_v14, %s3799_s24  ;;  %604 = vrot.lane.b32.xlu1 %v577_v16, %s3798_s12  ;;  %s3803_s12 = smov 100   ;;  %v684_v12 = vsel %vm682_vm2, %v4008_v18, 0 }
 0x112   : > { %4899 = vst [vmem:[#allocation16_spill] sm:$0xff] %v4012_v21  ;;  %3189 = vmatmul.mubr.msk.bf16.vlgmr.msra.gmra.mxu1 %vm682_vm2, %v4008_v18 }
 0x113   : > { %3200 = vmatprep.mubr.msk.bf16.mxu1 %vm3795_vm0, %v4873_v0 }
 0x115   : > { %610 = vrot.lane.b32.xlu0 %v577_v16, %s3799_s24  ;;  %3492 = vrot.lane.b32.xlu1 %v3486_v14, %s3800_s25  ;;  %s3807_s24 = smov 16  }
 0x119   : > { %616 = vrot.lane.b32.xlu0 %v577_v16, %s3797_s29  ;;  %665 = vrot.lane.b32.xlu1 %v502_v6, %s3801_s14  ;;  %s4901_s29 = sshll.u32 %s3971_s22, 3  ;;  %s4505_s22 = sand.u32 1, %s3780_s18  }
 0x11a   : > { %s493_s4 = scalar_lea.vmem %s4902_s3, %s4901_s29  ;;  %s3041_s15 = sshll.u32 %s4505_s22, 6 }
 0x11b   : > { %v505_v25 = vld [vmem:[%s493_s4] sm:$0xff]  ;;  %s3806_s29 = smov 12  }
 0x11d   : > { %622 = vrot.lane.b32.xlu0 %v577_v16, %s3800_s25  ;;  %668 = vrot.lane.b32.xlu1 %v502_v6, %s3802_s16  ;;  %s3808_s25 = smov 20  }
 0x121   : > { %3497 = vrot.lane.b32.xlu0 %v3496_v22, %s3801_s14  ;;  %671 = vrot.lane.b32.xlu1 %v502_v6, %s3803_s12  ;;  %s4531_s14 = scalar_lea.vmem [#allocation10], %s3041_s15  ;;  %s3098_s15 = sshll.u32 %s3896_s21, 7 }
 0x125   : > { %3502 = vrot.lane.b32.xlu0 %v3496_v22, %s3802_s16  ;;  %3507 = vrot.lane.b32.xlu1 %v3496_v22, %s3803_s12  ;;  %s3804_s16 = smov 4   ;;  %s4880_s12 = smov 8  }
 0x129   : > { %1579 = vperm.xlu1 %3512, %v503_v23   ;;  %1405 = vperm.xlu0 %3511, %v505_v25  }
 0x12d   : > { %1584 = vperm.xlu1 %3512, %v504_v24  }
 0x17f   : > { %v3488_v26 = vpop.permute.xlu1 %3487  ;;  %v3478_v27 = vpop.permute.xlu0 %3477 }
 0x180   : > { %v3479_v28 = vunpack.i.l.bf16 %v3478_v27  ;;  %v3489_v32 = vunpack.i.l.bf16 %v3488_v26  ;;  %v3480_v39 = vunpack.i.h.bf16 %v3478_v27  ;;  %v3490_v52 = vunpack.i.h.bf16 %v3488_v26 }
 0x182   : > { %v4028_v29 = vpack.c.bf16 %v3479_v28, %v3479_v28  ;;  %v4035_v38 = vpack.c.bf16 %v3489_v32, %v3489_v32 }
 0x183   : > { %v3483_v30 = vpop.permute.xlu0 %3482  ;;  %v605_v31 = vpop.permute.xlu1 %604 }
 0x184   : > { %v3484_v33 = vunpack.i.l.bf16 %v3483_v30  ;;  %v734_v34 = vsel %vm682_vm2, %v4028_v29, 0  ;;  %v4039_v42 = vpack.c.bf16 %v605_v31, %v3480_v39  ;;  %v3485_v45 = vunpack.i.h.bf16 %v3483_v30 }
 0x185   : > { %3193 = vmatpush3.bf16.xpose.msra.mxu0 %v734_v34  ;;  %v828_v47 = vsel %vm682_vm2, %v4035_v38, 0 }
 0x186   : > { %v4032_v35 = vpack.c.bf16 %v3484_v33, %v3484_v33  ;;  %3204 = vmatprep.subr.bf16.mxu0 %v4873_v0  ;;  %v731_v14 = vsel %vm682_vm2, %v4039_v42, 0 }
 0x187   : > { %v611_v36 = vpop.permute.xlu0 %610  ;;  %v3493_v37 = vpop.permute.xlu1 %3492 }
 0x188   : > { %v3494_v40 = vunpack.i.l.bf16 %v3493_v37  ;;  %v781_v41 = vsel %vm682_vm2, %v4032_v35, 0  ;;  %v4050_v48 = vpack.c.bf16 %v611_v36, %v3485_v45  ;;  %v3495_v57 = vunpack.i.h.bf16 %v3493_v37 }
 0x189   : > { %3199 = vmatpush3.bf16.xpose.msra.mxu1 %v781_v41 }
 0x18a   : > { %3210 = vmatprep.subr.bf16.mxu1 %v4873_v0  ;;  %v4042_v46 = vpack.c.bf16 %v3494_v40, %v3494_v40  ;;  %v778_v15 = vsel %vm682_vm2, %v4050_v48, 0 }
 0x18b   : > { %v617_v43 = vpop.permute.xlu0 %616  ;;  %v666_v44 = vpop.permute.xlu1 %665 }
 0x18c   : > { %4903 = vst [vmem:[#allocation17_spill] sm:$0xff] %v4042_v46  ;;  %3195 = vmatmul.mubr.msk.bf16.vlgmr.msra.gmra.mxu0 %vm682_vm2, %v4039_v42  ;;  %v4052_v49 = vpack.c.bf16 %v666_v44, %v666_v44  ;;  %v875_v53 = vsel %vm682_vm2, %v4042_v46, 0  ;;  %v4061_v54 = vpack.c.bf16 %v617_v43, %v3490_v52 }
 0x18d   : > { %3205 = vmatpush3.bf16.xpose.msra.mxu0 %v828_v47  ;;  %3206 = vmatprep.mubr.msk.bf16.mxu0 %vm3795_vm0, %v4873_v0 }
 0x18e   : > { %4904 = vst [vmem:[#allocation18_spill] sm:$0xff] %v4052_v49  ;;  %3216 = vmatprep.subr.bf16.mxu0 %v4873_v0  ;;  %v922_v56 = vsel %vm682_vm2, %v4052_v49, 0  ;;  %v825_v16 = vsel %vm682_vm2, %v4061_v54, 0 }
 0x18f   : > { %v623_v50 = vpop.permute.xlu0 %622  ;;  %v669_v51 = vpop.permute.xlu1 %668 }
 0x190   : > { %3201 = vmatmul.mubr.msk.bf16.vlgmr.msra.gmra.mxu1 %vm682_vm2, %v4050_v48  ;;  %v4063_v55 = vpack.c.bf16 %v669_v51, %v669_v51  ;;  %v4070_v59 = vpack.c.bf16 %v623_v50, %v3495_v57 }
 0x191   : > { %3211 = vmatpush3.bf16.xpose.msra.mxu1 %v875_v53  ;;  %3212 = vmatprep.mubr.msk.bf16.mxu1 %vm3795_vm0, %v4873_v0 }
 0x192   : > { %4905 = vst [vmem:[#allocation19_spill] sm:$0xff] %v4063_v55  ;;  %3222 = vmatprep.subr.bf16.mxu1 %v4873_v0  ;;  %v969_v1 = vsel %vm682_vm2, %v4063_v55, 0  ;;  %v872_v17 = vsel %vm682_vm2, %v4070_v59, 0 }
 0x193   : > { %v3498_v58 = vpop.permute.xlu0 %3497  ;;  %v672_v60 = vpop.permute.xlu1 %671 }
 0x194   : > { %3207 = vmatmul.mubr.msk.bf16.vlgmr.msra.gmra.mxu0 %vm682_vm2, %v4061_v54  ;;  %v3500_v61 = vunpack.i.h.bf16 %v3498_v58  ;;  %v3499_v62 = vunpack.i.l.bf16 %v3498_v58  ;;  %v4074_v63 = vpack.c.bf16 %v672_v60, %v672_v60 }
 0x195   : > { %3217 = vmatpush3.bf16.xpose.msra.mxu0 %v922_v56  ;;  %3218 = vmatprep.mubr.msk.bf16.mxu0 %vm3795_vm0, %v4873_v0 }
 0x196   : > { %4906 = vst [vmem:[#allocation20_spill] sm:$0xff] %v4074_v63  ;;  %3228 = vmatprep.subr.bf16.mxu0 %v4873_v0  ;;  %v4083_v3 = vpack.c.bf16 %v3500_v61, %v3499_v62  ;;  %v1016_v6 = vsel %vm682_vm2, %v4074_v63, 0 }
 0x197   : > { %v3503_v2 = vpop.permute.xlu0 %3502  ;;  %v3508_v8 = vpop.permute.xlu1 %3507 }
 0x198   : > { %3213 = vmatmul.mubr.msk.bf16.vlgmr.msra.gmra.mxu1 %vm682_vm2, %v4070_v59  ;;  %v3505_v4 = vunpack.i.h.bf16 %v3503_v2  ;;  %v3504_v5 = vunpack.i.l.bf16 %v3503_v2  ;;  %v3510_v10 = vunpack.i.h.bf16 %v3508_v8  ;;  %v3509_v11 = vunpack.i.l.bf16 %v3508_v8 }
 0x199   : > { %3223 = vmatpush3.bf16.xpose.msra.mxu1 %v969_v1  ;;  %3224 = vmatprep.mubr.msk.bf16.mxu1 %vm3795_vm0, %v4873_v0  ;;  %v919_v19 = vsel %vm682_vm2, %v4083_v3, 0 }
 0x19a   : > { %3234 = vmatprep.subr.bf16.mxu1 %v4873_v0  ;;  %v4092_v9 = vpack.c.bf16 %v3505_v4, %v3504_v5  ;;  %v4101_v13 = vpack.c.bf16 %v3510_v10, %v3509_v11 }
 0x19c   : > { %3219 = vmatmul.mubr.msk.bf16.vlgmr.msra.gmra.mxu0 %vm682_vm2, %v4083_v3  ;;  %v966_v20 = vsel %vm682_vm2, %v4092_v9, 0  ;;  %v1013_v22 = vsel %vm682_vm2, %v4101_v13, 0 }
 0x19d   : > { %3229 = vmatpush3.bf16.xpose.msra.mxu0 %v1016_v6  ;;  %3230 = vmatprep.mubr.msk.bf16.mxu0 %vm3795_vm0, %v4873_v0 }
 0x19e   : > { %3240 = vmatprep.subr.bf16.mxu0 %v4873_v0 }
 0x1a0   : > { %3225 = vmatmul.mubr.msk.bf16.vlgmr.msra.gmra.mxu1 %vm682_vm2, %v4092_v9 }
 0x1a1   : > { %3235 = vmatpush3.bf16.xpose.msra.mxu1 %v684_v12  ;;  %3236 = vmatprep.mubr.msk.bf16.mxu1 %vm3795_vm0, %v4873_v0 }
 0x1a2   : > { %3246 = vmatprep.subr.bf16.mxu1 %v4873_v0 }
 0x1a4   : > { %3231 = vmatmul.mubr.msk.bf16.vlgmr.msra.gmra.mxu0 %vm682_vm2, %v4101_v13  ;;  %v4165_v23 = vpop.permute.xlu1 %1579 }
 0x1a5   : > { %3241 = vmatpush3.bf16.xpose.msra.mxu0 %v731_v14  ;;  %3242 = vmatprep.mubr.msk.bf16.mxu0 %vm3795_vm0, %v4873_v0 }
 0x1a6   : > { %3252 = vmatprep.subr.bf16.mxu0 %v4873_v0 }
 0x1a8   : > { %3237 = vmatmul.mubr.msk.bf16.vlgmr.msra.gmra.mxu1 %vm682_vm2, %v4000_v7  ;;  %v4167_v27 = vpop.permute.xlu1 %1584 }
 0x1a9   : > { %3247 = vmatpush3.bf16.xpose.msra.mxu1 %v778_v15  ;;  %3248 = vmatprep.mubr.msk.bf16.mxu1 %vm3795_vm0, %v4873_v0 }
 0x1aa   : > { %3258 = vmatprep.subr.bf16.mxu1 %v4873_v0 }
 0x1ac   : > { %3243 = vmatmul.mubr.msk.bf16.vlgmr.msra.gmra.mxu0 %vm682_vm2, %v4028_v29 }
 0x1ad   : > { %3253 = vmatpush3.bf16.xpose.msra.mxu0 %v825_v16  ;;  %3254 = vmatprep.mubr.msk.bf16.mxu0 %vm3795_vm0, %v4873_v0 }
 0x1ae   : > { %3264 = vmatprep.subr.bf16.mxu0 %v4873_v0 }
 0x1b0   : > { %3249 = vmatmul.mubr.msk.bf16.vlgmr.msra.gmra.mxu1 %vm682_vm2, %v4032_v35 }
 0x1b1   : > { %3259 = vmatpush3.bf16.xpose.msra.mxu1 %v872_v17  ;;  %3260 = vmatprep.mubr.msk.bf16.mxu1 %vm3795_vm0, %v4873_v0 }
 0x1b2   : > { %3270 = vmatprep.subr.bf16.mxu1 %v4873_v0 }
 0x1b4   : > { %3255 = vmatmul.mubr.msk.bf16.vlgmr.msra.gmra.mxu0 %vm682_vm2, %v4035_v38 }
 0x1b5   : > { %3265 = vmatpush3.bf16.xpose.msra.mxu0 %v919_v19  ;;  %3266 = vmatprep.mubr.msk.bf16.mxu0 %vm3795_vm0, %v4873_v0 }
 0x1b6   : > { %3276 = vmatprep.subr.bf16.mxu0 %v4873_v0 }
 0x1b8   : > { %3261 = vmatmul.mubr.msk.bf16.vlgmr.msra.gmra.mxu1 %vm682_vm2, %v4042_v46 }
 0x1b9   : > { %3271 = vmatpush3.bf16.xpose.msra.mxu1 %v966_v20  ;;  %3272 = vmatprep.mubr.msk.bf16.mxu1 %vm3795_vm0, %v4873_v0 }
 0x1ba   : > { %3282 = vmatprep.subr.bf16.mxu1 %v4873_v0 }
 0x1bc   : > { %3267 = vmatmul.mubr.msk.bf16.vlgmr.msra.gmra.mxu0 %vm682_vm2, %v4052_v49 }
 0x1bd   : > { %3277 = vmatpush3.bf16.xpose.msra.mxu0 %v1013_v22  ;;  %3278 = vmatprep.mubr.msk.bf16.mxu0 %vm3795_vm0, %v4873_v0 }
 0x1be   : > { %3288 = vmatprep.subr.bf16.mxu0 %v4873_v0 }
 0x1c0   : > { %3273 = vmatmul.mubr.msk.bf16.vlgmr.msra.gmra.mxu1 %vm682_vm2, %v4063_v55 }
 0x1c1   : > { %3283 = vmatpush3.bf16.msra.mxu1 %v4008_v18  ;;  %3284 = vmatprep.mubr.msk.bf16.mxu1 %vm3795_vm0, %v4873_v0 }
 0x1c2   : > { %3294 = vmatprep.subr.bf16.mxu1 %v4873_v0 }
 0x1c4   : > { %3279 = vmatmul.mubr.msk.bf16.vlgmr.msra.gmra.mxu0 %vm682_vm2, %v4074_v63 }
 0x1c5   : > { %3289 = vmatpush3.bf16.msra.mxu0 %v4039_v42  ;;  %3290 = vmatprep.mubr.msk.bf16.mxu0 %vm3795_vm0, %v4873_v0 }
 0x1c6   : > { %3300 = vmatprep.subr.bf16.mxu0 %v4873_v0 }
 0x1d2   : > { %v723_v24 = vpop.f32.mrf.mxu1 }
 0x1d3   : > { %v1059_v25 = vmul.f32 0.5, %v723_v24 }
 0x1d4   : > { %v3190_v18 = vpop.f32.mrf.mxu1 }
 0x1d5   : > { %v1587_v28 = vadd.f32 %v4165_v23, %v1059_v25 }
 0x1d6   : > { %v726_v26 = vpop.f32.mrf.mxu1 }
 0x1d7   : > { %v1060_v30 = vmul.f32 0.5, %v726_v26  ;;  %v1604_v33 = vsel %vm1603_vm3, %v1587_v28, -inf }
 0x1d8   : > { %v3191_v31 = vpop.f32.mrf.mxu1 }
 0x1d9   : > { %v1588_v32 = vadd.f32 %v4167_v27, %v1060_v30 }
 0x1db   : > { %v1605_v34 = vsel %vm1603_vm3, %v1588_v32, -inf }
 0x1dc   : > { %v1606_v36 = vmax.f32 %v1604_v33, %v1605_v34 }
 0x1de   : > { %v1607_v37 = vrot.slane %v1606_v36, 4 }
 0x1e0   : > { %v1608_v39 = vmax.f32 %v1606_v36, %v1607_v37 }
 0x1e2   : > { %v1609_v40 = vrot.slane %v1608_v39, 2 }
 0x1e4   : > { %v1610_v41 = vmax.f32 %v1608_v39, %v1609_v40 }
 0x1e6   : > { %v1611_v42 = vrot.slane %v1610_v41, 1 }
 0x1e8   : > { %v1612_v43 = vmax.f32 %v1610_v41, %v1611_v42 }
 0x1ea   : > { %v1676_v44 = vsub.f32 %v1587_v28, %v1612_v43  ;;  %v1677_v45 = vsub.f32 %v1588_v32, %v1612_v43 }
 0x1ec   : > { %v1692_v47 = vmul.f32 1.442695, %v1676_v44  ;;  %v1694_v50 = vmul.f32 1.442695, %v1677_v45 }
 0x1ee   : > { %3517 = vpow2.f32 %v1692_v47 }
 0x1ef   : > { %3519 = vpow2.f32 %v1694_v50 }
 0x1fb   : > { %v3518_v51 = vpop.eup %3517 }
 0x1fc   : > { %v3520_v52 = vpop.eup %3519  ;;  %v1724_v53 = vsel %vm1603_vm3, %v3518_v51, 0.0 }
 0x1fd   : > { %v1725_v56 = vsel %vm1603_vm3, %v3520_v52, 0.0 }
 0x1fe   : > { %v1726_v57 = vadd.f32 %v1725_v56, %v1724_v53 }
 0x200   : > { %v1727_v58 = vrot.slane %v1726_v57, 4 }
 0x202   : > { %v1728_v60 = vadd.f32 %v1727_v58, %v1726_v57 }
 0x204   : > { %v1729_v61 = vrot.slane %v1728_v60, 2 }
 0x206   : > { %v1730_v62 = vadd.f32 %v1729_v61, %v1728_v60 }
 0x208   : > { %v1731_v1 = vrot.slane %v1730_v62, 1 }
 0x20a   : > { %v1732_v2 = vadd.f32 %v1731_v1, %v1730_v62 }
 0x20c   : > { %3521 = vrcp.f32 %v1732_v2 }
 0x219   : > { %v3522_v4 = vpop.eup %3521 }
 0x21a   : > { %v4181_v5 = vmul.f32 %v3522_v4, %v3518_v51  ;;  %v4183_v6 = vmul.f32 %v3522_v4, %v3520_v52 }
 0x21c   : > { %1820 = vst.msk [vmem:[%s4179_s26] sm:$0xff] %vm1603_vm3, %v4181_v5  ;;  %1821 = vst.msk [vmem:[%s4179_s26 + $0x8] sm:$0xff] %vm1603_vm3, %v4183_v6 }
 0x24c   : > { %v770_v10 = vpop.f32.mrf.mxu0 }
 0x24d   : > { %v1061_v11 = vmul.f32 0.5, %v770_v10 }
 0x24e   : > { %v3196_v12 = vpop.f32.mrf.mxu0 }
 0x24f   : > { %v4194_v14 = vadd.f32 %v4165_v23, %v1061_v11 }
 0x250   : > { %v773_v15 = vpop.f32.mrf.mxu0  ;;  %v817_v16 = vpop.f32.mrf.mxu1 }
 0x251   : > { %v1062_v17 = vmul.f32 0.5, %v773_v15  ;;  %v1063_v19 = vmul.f32 0.5, %v817_v16  ;;  %v1613_v25 = vsel %vm1603_vm3, %v4194_v14, -inf }
 0x252   : > { %v3197_v20 = vpop.f32.mrf.mxu0  ;;  %v3202_v22 = vpop.f32.mrf.mxu1 }
 0x253   : > { %v4197_v24 = vadd.f32 %v4167_v27, %v1062_v17  ;;  %v4204_v30 = vadd.f32 %v4165_v23, %v1063_v19 }
 0x254   : > { %v820_v18 = vpop.f32.mrf.mxu1  ;;  %v864_v26 = vpop.f32.mrf.mxu0 }
 0x255   : > { %v1614_v28 = vsel %vm1603_vm3, %v4197_v24, -inf  ;;  %v1064_v31 = vmul.f32 0.5, %v820_v18  ;;  %v1065_v32 = vmul.f32 0.5, %v864_v26  ;;  %v1622_v43 = vsel %vm1603_vm3, %v4204_v30, -inf }
 0x256   : > { %v1615_v33 = vmax.f32 %v1613_v25, %v1614_v28  ;;  %v3203_v34 = vpop.f32.mrf.mxu1  ;;  %v3208_v36 = vpop.f32.mrf.mxu0 }
 0x257   : > { %v4207_v37 = vadd.f32 %v4167_v27, %v1064_v31  ;;  %v4210_v40 = vadd.f32 %v4165_v23, %v1065_v32 }
 0x258   : > { %v1616_v39 = vrot.slane %v1615_v33, 4  ;;  %v867_v41 = vpop.f32.mrf.mxu0  ;;  %v911_v42 = vpop.f32.mrf.mxu1 }
 0x259   : > { %v1623_v44 = vsel %vm1603_vm3, %v4207_v37, -inf  ;;  %v1066_v45 = vmul.f32 0.5, %v867_v41  ;;  %v1067_v47 = vmul.f32 0.5, %v911_v42  ;;  %v1631_v60 = vsel %vm1603_vm3, %v4210_v40, -inf }
 0x25a   : > { %v1617_v50 = vmax.f32 %v1615_v33, %v1616_v39  ;;  %v1624_v51 = vmax.f32 %v1622_v43, %v1623_v44  ;;  %v3209_v52 = vpop.f32.mrf.mxu0  ;;  %v3214_v53 = vpop.f32.mrf.mxu1 }
 0x25b   : > { %v4217_v56 = vadd.f32 %v4167_v27, %v1066_v45  ;;  %v4224_v2 = vadd.f32 %v4165_v23, %v1067_v47 }
 0x25c   : > { %v1618_v57 = vrot.slane %v1617_v50, 2  ;;  %v1625_v58 = vrot.slane %v1624_v51, 4  ;;  %v914_v61 = vpop.f32.mrf.mxu1  ;;  %v958_v62 = vpop.f32.mrf.mxu0 }
 0x25d   : > { %v1632_v1 = vsel %vm1603_vm3, %v4217_v56, -inf  ;;  %v1068_v4 = vmul.f32 0.5, %v914_v61  ;;  %v1069_v10 = vmul.f32 0.5, %v958_v62  ;;  %v1640_v31 = vsel %vm1603_vm3, %v4224_v2, -inf }
 0x25e   : > { %v1619_v11 = vmax.f32 %v1617_v50, %v1618_v57  ;;  %v1626_v12 = vmax.f32 %v1624_v51, %v1625_v58  ;;  %v1633_v15 = vmax.f32 %v1631_v60, %v1632_v1  ;;  %v3215_v16 = vpop.f32.mrf.mxu1  ;;  %v3220_v17 = vpop.f32.mrf.mxu0 }
 0x25f   : > { %v4227_v19 = vadd.f32 %v4167_v27, %v1068_v4  ;;  %v4230_v20 = vadd.f32 %v4165_v23, %v1069_v10 }
 0x260   : > { %v1620_v22 = vrot.slane %v1619_v11, 1  ;;  %v1627_v25 = vrot.slane %v1626_v12, 2  ;;  %v1634_v18 = vrot.slane %v1633_v15, 4  ;;  %v961_v26 = vpop.f32.mrf.mxu0  ;;  %v1005_v28 = vpop.f32.mrf.mxu1 }
 0x261   : > { %v1641_v32 = vsel %vm1603_vm3, %v4227_v19, -inf  ;;  %v1070_v33 = vmul.f32 0.5, %v961_v26  ;;  %v1071_v34 = vmul.f32 0.5, %v1005_v28  ;;  %v1649_v45 = vsel %vm1603_vm3, %v4230_v20, -inf }
 0x262   : > { %v1621_v36 = vmax.f32 %v1619_v11, %v1620_v22  ;;  %v1628_v39 = vmax.f32 %v1626_v12, %v1627_v25  ;;  %v1635_v41 = vmax.f32 %v1633_v15, %v1634_v18  ;;  %v1642_v42 = vmax.f32 %v1640_v31, %v1641_v32  ;;  %v3221_v43 = vpop.f32.mrf.mxu0  ;;  %v3226_v44 = vpop.f32.mrf.mxu1 }
 0x263   : > { %v4239_v47 = vadd.f32 %v4167_v27, %v1070_v33  ;;  %v4242_v50 = vadd.f32 %v4165_v23, %v1071_v34 }
 0x264   : > { %v1678_v51 = vsub.f32 %v4194_v14, %v1621_v36  ;;  %v1679_v52 = vsub.f32 %v4197_v24, %v1621_v36  ;;  %v1629_v53 = vrot.slane %v1628_v39, 1  ;;  %v1636_v57 = vrot.slane %v1635_v41, 2  ;;  %v1008_v58 = vpop.f32.mrf.mxu1  ;;  %v1052_v60 = vpop.f32.mrf.mxu0 }
 0x265   : > { %v1643_v61 = vrot.slane %v1642_v42, 4  ;;  %v1650_v62 = vsel %vm1603_vm3, %v4239_v47, -inf  ;;  %v1658_v1 = vsel %vm1603_vm3, %v4242_v50, -inf  ;;  %v1072_v4 = vmul.f32 0.5, %v1008_v58 }
 0x266   : > { %v1696_v10 = vmul.f32 1.442695, %v1678_v51  ;;  %v1698_v11 = vmul.f32 1.442695, %v1679_v52  ;;  %v1630_v12 = vmax.f32 %v1628_v39, %v1629_v53  ;;  %v1637_v15 = vmax.f32 %v1635_v41, %v1636_v57  ;;  %v3227_v16 = vpop.f32.mrf.mxu1  ;;  %v3232_v14 = vpop.f32.mrf.mxu0 }
 0x267   : > { %v1644_v17 = vmax.f32 %v1642_v42, %v1643_v61  ;;  %v1651_v24 = vmax.f32 %v1649_v45, %v1650_v62  ;;  %v4251_v22 = vadd.f32 %v4167_v27, %v1072_v4  ;;  %v1073_v25 = vmul.f32 0.5, %v1052_v60 }
 0x268   : > { %3523 = vpow2.f32 %v1696_v10  ;;  %v1680_v18 = vsub.f32 %v4204_v30, %v1630_v12  ;;  %v1681_v26 = vsub.f32 %v4207_v37, %v1630_v12  ;;  %v1638_v28 = vrot.slane %v1637_v15, 1  ;;  %v1055_v31 = vpop.f32.mrf.mxu0  ;;  %v1109_v32 = vpop.f32.mrf.mxu1 }
 0x269   : > { %3525 = vpow2.f32 %v1698_v11  ;;  %v1645_v33 = vrot.slane %v1644_v17, 2  ;;  %v1652_v34 = vrot.slane %v1651_v24, 4  ;;  %v1659_v36 = vsel %vm1603_vm3, %v4251_v22, -inf }
 0x26a   : > { %v1700_v39 = vmul.f32 1.442695, %v1680_v18  ;;  %v1702_v41 = vmul.f32 1.442695, %v1681_v26  ;;  %v1639_v42 = vmax.f32 %v1637_v15, %v1638_v28  ;;  %v1660_v43 = vmax.f32 %v1658_v1, %v1659_v36  ;;  %v3233_v44 = vpop.f32.mrf.mxu0  ;;  %v3238_v45 = vpop.f32.mrf.mxu1 }
 0x26b   : > { %v1646_v51 = vmax.f32 %v1644_v17, %v1645_v33  ;;  %v1653_v52 = vmax.f32 %v1651_v24, %v1652_v34  ;;  %v4258_v30 = vadd.f32 %v4165_v23, %v1073_v25  ;;  %v1074_v37 = vmul.f32 0.5, %v1055_v31  ;;  %v4265_v17 = vpop.permute.xlu0 %1405 }
 0x26c   : > { %3527 = vpow2.f32 %v1700_v39  ;;  %v1682_v53 = vsub.f32 %v4210_v40, %v1639_v42  ;;  %v1683_v57 = vsub.f32 %v4217_v56, %v1639_v42  ;;  %v1661_v58 = vrot.slane %v1660_v43, 4  ;;  %v1112_v60 = vpop.f32.mrf.mxu1  ;;  %v1149_v61 = vpop.f32.mrf.mxu0 }
 0x26d   : > { %3529 = vpow2.f32 %v1702_v41  ;;  %v1647_v62 = vrot.slane %v1646_v51, 1  ;;  %v1654_v4 = vrot.slane %v1653_v52, 2  ;;  %v4263_v12 = vadd.f32 %v4167_v27, %v1074_v37 }
 0x26e   : > { %v1704_v1 = vmul.f32 1.442695, %v1682_v53  ;;  %v1706_v10 = vmul.f32 1.442695, %v1683_v57  ;;  %v1662_v11 = vmax.f32 %v1660_v43, %v1661_v58  ;;  %v3239_v23 = vpop.f32.mrf.mxu1  ;;  %v3244_v15 = vpop.f32.mrf.mxu0  ;;  %v1395_v40 = vmul.f32 0.5, %v1109_v32 }
 0x26f   : > { %v1648_v16 = vmax.f32 %v1646_v51, %v1647_v62  ;;  %v1655_v14 = vmax.f32 %v1653_v52, %v1654_v4  ;;  %v1396_v56 = vmul.f32 0.5, %v1149_v61  ;;  %v1667_v25 = vsel %vm1603_vm3, %v4258_v30, -inf }
 0x270   : > { %3531 = vpow2.f32 %v1704_v1  ;;  %v1663_v24 = vrot.slane %v1662_v11, 2  ;;  %v1668_v18 = vsel %vm1603_vm3, %v4263_v12, -inf  ;;  %v1152_v26 = vpop.f32.mrf.mxu0  ;;  %v1189_v28 = vpop.f32.mrf.mxu1  ;;  %v4274_v36 = vadd.f32 %v4265_v17, %v1395_v40 }
 0x271   : > { %3533 = vpow2.f32 %v1706_v10  ;;  %v1684_v27 = vsub.f32 %v4224_v2, %v1648_v16  ;;  %v1685_v31 = vsub.f32 %v4227_v19, %v1648_v16  ;;  %v1656_v33 = vrot.slane %v1655_v14, 1 }
 0x272   : > { %v1664_v32 = vmax.f32 %v1662_v11, %v1663_v24  ;;  %v1669_v34 = vmax.f32 %v1667_v25, %v1668_v18  ;;  %v4277_v39 = vadd.f32 %v4265_v17, %v1396_v56  ;;  %v3245_v41 = vpop.f32.mrf.mxu0  ;;  %v3250_v42 = vpop.f32.mrf.mxu1  ;;  %v1397_v51 = vmul.f32 0.5, %v1189_v28 }
 0x273   : > { %v1708_v43 = vmul.f32 1.442695, %v1684_v27  ;;  %v1710_v44 = vmul.f32 1.442695, %v1685_v31  ;;  %v1657_v45 = vmax.f32 %v1655_v14, %v1656_v33  ;;  %v1417_v2 = vsel %vm1416_vm4, %v4274_v36, -inf }
 0x274   : > { %v1665_v52 = vrot.slane %v1664_v32, 1  ;;  %v1670_v37 = vrot.slane %v1669_v34, 4  ;;  %v1424_v19 = vsel %vm1416_vm4, %v4277_v39, -inf  ;;  %v1192_v53 = vpop.f32.mrf.mxu1  ;;  %v4283_v57 = vpop.f32.mrf.mxu0  ;;  %v1418_v62 = vrot.slane %v1417_v2, 4 }
 0x275   : > { %v4285_v58 = vpop.eup %3523  ;;  %3535 = vpow2.f32 %v1708_v43  ;;  %v1686_v60 = vsub.f32 %v4230_v20, %v1657_v45  ;;  %v1687_v61 = vsub.f32 %v4239_v47, %v1657_v45  ;;  %v1425_v31 = vrot.slane %v1424_v19, 4 }
 0x276   : > { %v4289_v4 = vpop.eup %3525  ;;  %v1733_v1 = vsel %vm1603_vm3, %v4285_v58, 0.0  ;;  %3537 = vpow2.f32 %v1710_v44  ;;  %v1666_v10 = vmax.f32 %v1664_v32, %v1665_v52  ;;  %v1671_v11 = vmax.f32 %v1669_v34, %v1670_v37  ;;  %v3251_v23 = vpop.f32.mrf.mxu1 }
 0x277   : > { %v3256_v15 = vpop.f32.mrf.mxu0  ;;  %v1734_v16 = vsel %vm1603_vm3, %v4289_v4, 0.0  ;;  %v1712_v14 = vmul.f32 1.442695, %v1686_v60  ;;  %v1714_v40 = vmul.f32 1.442695, %v1687_v61  ;;  %v1419_v56 = vmax.f32 %v1417_v2, %v1418_v62 }
 0x278   : > { %v1735_v20 = vadd.f32 %v1734_v16, %v1733_v1  ;;  %v1688_v47 = vsub.f32 %v4242_v50, %v1666_v10  ;;  %v1689_v24 = vsub.f32 %v4251_v22, %v1666_v10  ;;  %v1672_v25 = vrot.slane %v1671_v11, 2  ;;  %v4297_v26 = vpop.f32.mrf.mxu1 }
 0x279   : > { %v1232_v18 = vpop.f32.mrf.mxu0  ;;  %v4299_v28 = vpop.eup %3527  ;;  %3539 = vpow2.f32 %v1712_v14  ;;  %v1420_v27 = vrot.slane %v1419_v56, 2  ;;  %v4302_v33 = vadd.f32 %v4265_v17, %v1397_v51  ;;  %v1426_v51 = vmax.f32 %v1424_v19, %v1425_v31 }
 0x27a   : > { %v4304_v32 = vpop.eup %3529  ;;  %v1736_v34 = vrot.slane %v1735_v20, 4  ;;  %v1742_v50 = vsel %vm1603_vm3, %v4299_v28, 0.0  ;;  %3541 = vpow2.f32 %v1714_v40  ;;  %v1716_v22 = vmul.f32 1.442695, %v1688_v47  ;;  %v3262_v42 = vpop.f32.mrf.mxu1 }
 0x27b   : > { %v3257_v41 = vpop.f32.mrf.mxu0  ;;  %v1743_v43 = vsel %vm1603_vm3, %v4304_v32, 0.0  ;;  %v1718_v44 = vmul.f32 1.442695, %v1689_v24  ;;  %v1673_v45 = vmax.f32 %v1671_v11, %v1672_v25  ;;  %v1421_v52 = vmax.f32 %v1419_v56, %v1420_v27 }
 0x27c   : > { %v1737_v37 = vadd.f32 %v1736_v34, %v1735_v20  ;;  %v1744_v2 = vadd.f32 %v1743_v43, %v1742_v50  ;;  %3543 = vpow2.f32 %v1716_v22  ;;  %v1272_v53 = vpop.f32.mrf.mxu1  ;;  %v1431_v10 = vsel %vm1416_vm4, %v4302_v33, -inf }
 0x27d   : > { %v4310_v60 = vpop.f32.mrf.mxu0  ;;  %v4312_v61 = vpop.eup %3531  ;;  %3545 = vpow2.f32 %v1718_v44  ;;  %v1674_v62 = vrot.slane %v1673_v45, 1  ;;  %v1422_v1 = vrot.slane %v1421_v52, 1  ;;  %v1427_v14 = vrot.slane %v1426_v51, 2 }
 0x27e   : > { %v4316_v23 = vpop.eup %3533  ;;  %v1738_v15 = vrot.slane %v1737_v37, 2  ;;  %v1745_v11 = vrot.slane %v1744_v2, 4  ;;  %v1751_v16 = vsel %vm1603_vm3, %v4312_v61, 0.0  ;;  %v3263_v19 = vpop.f32.mrf.mxu1  ;;  %v1432_v24 = vrot.slane %v1431_v10, 4 }
 0x27f   : > { %v3268_v40 = vpop.f32.mrf.mxu0  ;;  %v1752_v56 = vsel %vm1603_vm3, %v4316_v23, 0.0  ;;  %v1675_v20 = vmax.f32 %v1673_v45, %v1674_v62  ;;  %v1423_v47 = vmax.f32 %v1421_v52, %v1422_v1  ;;  %v1428_v31 = vmax.f32 %v1426_v51, %v1427_v14 }
 0x280   : > { %v1739_v25 = vadd.f32 %v1738_v15, %v1737_v37  ;;  %v1746_v18 = vadd.f32 %v1745_v11, %v1744_v2  ;;  %v1753_v27 = vadd.f32 %v1752_v56, %v1751_v16  ;;  %v4322_v50 = vpop.f32.mrf.mxu1  ;;  %v1433_v43 = vmax.f32 %v1431_v10, %v1432_v24 }
 0x281   : > { %v1312_v34 = vpop.f32.mrf.mxu0  ;;  %v1690_v22 = vsub.f32 %v4258_v30, %v1675_v20  ;;  %v1691_v41 = vsub.f32 %v4263_v12, %v1675_v20  ;;  %v1473_v42 = vsub.f32 %v4274_v36, %v1423_v47  ;;  %v1429_v62 = vrot.slane %v1428_v31, 1 }
 0x282   : > { %v4327_v44 = vpop.eup %3535  ;;  %v1740_v53 = vrot.slane %v1739_v25, 1  ;;  %v1747_v45 = vrot.slane %v1746_v18, 2  ;;  %v1754_v52 = vrot.slane %v1753_v27, 4  ;;  %v3274_v2 = vpop.f32.mrf.mxu1  ;;  %v1434_v11 = vrot.slane %v1433_v43, 2 }
 0x283   : > { %v3269_v37 = vpop.f32.mrf.mxu0  ;;  %v4329_v1 = vpop.eup %3537  ;;  %v1760_v51 = vsel %vm1603_vm3, %v4327_v44, 0.0  ;;  %v1720_v15 = vmul.f32 1.442695, %v1690_v22  ;;  %v1722_v30 = vmul.f32 1.442695, %v1691_v41  ;;  %v1430_v20 = vmax.f32 %v1428_v31, %v1429_v62 }
 0x284   : > { %v1741_v12 = vadd.f32 %v1740_v53, %v1739_v25  ;;  %v1748_v16 = vadd.f32 %v1747_v45, %v1746_v18  ;;  %v1755_v36 = vadd.f32 %v1754_v52, %v1753_v27  ;;  %v1761_v10 = vsel %vm1603_vm3, %v4329_v1, 0.0  ;;  %v1352_v14 = vpop.f32.mrf.mxu1 }
 0x285   : > { %v4335_v19 = vpop.f32.mrf.mxu0  ;;  %v1762_v40 = vadd.f32 %v1761_v10, %v1760_v51  ;;  %3547 = vpow2.f32 %v1720_v15  ;;  %v1481_v56 = vmul.f32 1.442695, %v1473_v42  ;;  %v1435_v22 = vmax.f32 %v1433_v43, %v1434_v11 }
 0x286   : > { %v4337_v47 = vpop.eup %3539  ;;  %3549 = vrcp.f32 %v1741_v12  ;;  %v1749_v24 = vrot.slane %v1748_v16, 1  ;;  %v1756_v34 = vrot.slane %v1755_v36, 2  ;;  %v3275_v41 = vpop.f32.mrf.mxu1  ;;  %v1474_v45 = vsub.f32 %v4277_v39, %v1430_v20 }
 0x287   : > { %v3280_v25 = vpop.f32.mrf.mxu0  ;;  %v4339_v18 = vpop.eup %3541  ;;  %v1763_v27 = vrot.slane %v1762_v40, 4  ;;  %v1769_v53 = vsel %vm1603_vm3, %v4337_v47, 0.0  ;;  %3551 = vpow2.f32 %v1722_v30  ;;  %v1436_v15 = vrot.slane %v1435_v22, 1 }
 0x288   : > { %v1750_v52 = vadd.f32 %v1749_v24, %v1748_v16  ;;  %v1757_v42 = vadd.f32 %v1756_v34, %v1755_v36  ;;  %v1770_v31 = vsel %vm1603_vm3, %v4339_v18, 0.0  ;;  %3553 = vpow2.f32 %v1481_v56 }
 0x289   : > { %v1392_v62 = vpop.f32.mrf.mxu0  ;;  %v4346_v37 = vpop.eup %3543  ;;  %v1764_v43 = vadd.f32 %v1763_v27, %v1762_v40  ;;  %v1771_v2 = vadd.f32 %v1770_v31, %v1769_v53  ;;  %v1483_v51 = vmul.f32 1.442695, %v1474_v45  ;;  %v1398_v30 = vmul.f32 0.5, %v4283_v57 }
 0x28a   : > { %v4348_v11 = vpop.eup %3545  ;;  %3555 = vrcp.f32 %v1750_v52  ;;  %v1758_v12 = vrot.slane %v1757_v42, 1  ;;  %v1778_v39 = vsel %vm1603_vm3, %v4346_v37, 0.0  ;;  %v1437_v20 = vmax.f32 %v1435_v22, %v1436_v15 }
 0x28b   : > { %v3281_v16 = vpop.f32.mrf.mxu0  ;;  %v1765_v36 = vrot.slane %v1764_v43, 2  ;;  %v1772_v10 = vrot.slane %v1771_v2, 4  ;;  %v1779_v14 = vsel %vm1603_vm3, %v4348_v11, 0.0  ;;  %3557 = vpow2.f32 %v1483_v51 }
 0x28c   : > { %v1759_v40 = vadd.f32 %v1758_v12, %v1757_v42  ;;  %v1780_v56 = vadd.f32 %v1779_v14, %v1778_v39  ;;  %v4356_v24 = vadd.f32 %v4265_v17, %v1398_v30  ;;  %v1399_v25 = vmul.f32 0.5, %v4297_v26 }
 0x28d   : > { %v1766_v34 = vadd.f32 %v1765_v36, %v1764_v43  ;;  %v1773_v41 = vadd.f32 %v1772_v10, %v1771_v2  ;;  %v1400_v27 = vmul.f32 0.5, %v4310_v60  ;;  %v1475_v53 = vsub.f32 %v4302_v33, %v1437_v20 }
 0x28e   : > { %3559 = vrcp.f32 %v1759_v40  ;;  %v1781_v57 = vrot.slane %v1780_v56, 4  ;;  %v1438_v45 = vsel %vm1416_vm4, %v4356_v24, -inf  ;;  %v4364_v22 = vadd.f32 %v4265_v17, %v1399_v25 }
 0x28f   : > { %v1767_v52 = vrot.slane %v1766_v34, 1  ;;  %v1774_v42 = vrot.slane %v1773_v41, 2  ;;  %v1439_v31 = vrot.slane %v1438_v45, 4  ;;  %v1485_v43 = vmul.f32 1.442695, %v1475_v53 }
 0x290   : > { %v1782_v62 = vadd.f32 %v1781_v57, %v1780_v56  ;;  %v4367_v2 = vadd.f32 %v4265_v17, %v1400_v27  ;;  %v1401_v26 = vmul.f32 0.5, %v4322_v50  ;;  %v1445_v33 = vsel %vm1416_vm4, %v4364_v22, -inf }
 0x291   : > { %v1768_v60 = vadd.f32 %v1767_v52, %v1766_v34  ;;  %v1775_v51 = vadd.f32 %v1774_v42, %v1773_v41  ;;  %v1440_v15 = vmax.f32 %v1438_v45, %v1439_v31  ;;  %3561 = vpow2.f32 %v1485_v43 }
 0x292   : > { %v4372_v12 = vpop.eup %3547  ;;  %v1783_v39 = vrot.slane %v1782_v62, 2  ;;  %v1446_v30 = vrot.slane %v1445_v33, 4  ;;  %v1452_v16 = vsel %vm1416_vm4, %v4367_v2, -inf  ;;  %v4383_v41 = vadd.f32 %v4265_v17, %v1401_v26 }
 0x293   : > { %v4376_v36 = vpop.eup %3549  ;;  %3563 = vrcp.f32 %v1768_v60  ;;  %v1776_v10 = vrot.slane %v1775_v51, 1  ;;  %v1787_v50 = vsel %vm1603_vm3, %v4372_v12, 0.0  ;;  %v1441_v14 = vrot.slane %v1440_v15, 2 }
 0x294   : > { %v4380_v40 = vpop.eup %3551  ;;  %v1784_v56 = vadd.f32 %v1783_v39, %v1782_v62  ;;  %v1447_v20 = vmax.f32 %v1445_v33, %v1446_v30  ;;  %v1453_v34 = vrot.slane %v1452_v16, 4  ;;  %v1402_v45 = vmul.f32 0.5, %v4335_v19 }
 0x295   : > { %v4385_v25 = vpop.eup %3553  ;;  %v1777_v27 = vadd.f32 %v1776_v10, %v1775_v51  ;;  %v1788_v57 = vsel %vm1603_vm3, %v4380_v40, 0.0  ;;  %v1442_v53 = vmax.f32 %v1440_v15, %v1441_v14  ;;  %v1459_v26 = vsel %vm1416_vm4, %v4383_v41, -inf }
 0x296   : > { %v1785_v52 = vrot.slane %v1784_v56, 1  ;;  %v1789_v42 = vadd.f32 %v1788_v57, %v1787_v50  ;;  %v1448_v31 = vrot.slane %v1447_v20, 2  ;;  %v1454_v43 = vmax.f32 %v1452_v16, %v1453_v34 }
 0x297   : > { %v4390_v60 = vpop.eup %3555  ;;  %3565 = vrcp.f32 %v1777_v27  ;;  %v1443_v62 = vrot.slane %v1442_v53, 1  ;;  %v4395_v33 = vadd.f32 %v4265_v17, %v1402_v45  ;;  %v1460_v50 = vrot.slane %v1459_v26, 4 }
 0x298   : > { %v4397_v51 = vpop.eup %3557  ;;  %v1786_v39 = vadd.f32 %v1785_v52, %v1784_v56  ;;  %v1790_v15 = vrot.slane %v1789_v42, 4  ;;  %v1449_v30 = vmax.f32 %v1447_v20, %v1448_v31  ;;  %v1455_v19 = vrot.slane %v1454_v43, 2 }
 0x299   : > { %v1504_v10 = vsel %vm1416_vm4, %v4397_v51, 0.0  ;;  %v1444_v16 = vmax.f32 %v1442_v53, %v1443_v62  ;;  %v1466_v14 = vsel %vm1416_vm4, %v4395_v33, -inf  ;;  %v1461_v56 = vmax.f32 %v1459_v26, %v1460_v50 }
 0x29a   : > { %3567 = vrcp.f32 %v1786_v39  ;;  %v1791_v34 = vadd.f32 %v1790_v15, %v1789_v42  ;;  %v1505_v27 = vrot.slane %v1504_v10, 4  ;;  %v1450_v57 = vrot.slane %v1449_v30, 1 }
 0x29b   : > { %v3560_v17 = vpop.eup %3559  ;;  %v1476_v45 = vsub.f32 %v4356_v24, %v1444_v16  ;;  %v1456_v8 = vmax.f32 %v1454_v43, %v1455_v19  ;;  %v1467_v52 = vrot.slane %v1466_v14, 4  ;;  %v1497_v53 = vsel %vm1416_vm4, %v4385_v25, 0.0 }
 0x29c   : > { %v1792_v20 = vrot.slane %v1791_v34, 2  ;;  %v1506_v31 = vadd.f32 %v1505_v27, %v1504_v10  ;;  %v1451_v0 = vmax.f32 %v1449_v30, %v1450_v57  ;;  %v1462_v63 = vrot.slane %v1461_v56, 2 }
 0x29d   : > { %v1487_v62 = vmul.f32 1.442695, %v1476_v45  ;;  %v1457_v21 = vrot.slane %v1456_v8, 1  ;;  %v1468_v55 = vmax.f32 %v1466_v14, %v1467_v52  ;;  %v1498_v49 = vrot.slane %v1497_v53, 4 }
 0x29e   : > { %v1793_v39 = vadd.f32 %v1792_v20, %v1791_v34  ;;  %v1507_v42 = vrot.slane %v1506_v31, 2  ;;  %v1477_v15 = vsub.f32 %v4364_v22, %v1451_v0  ;;  %v4407_v46 = vpop.eup %3561  ;;  %v1463_v43 = vmax.f32 %v1461_v56, %v1462_v63 }
 0x29f   : > { %3569 = vpow2.f32 %v1487_v62  ;;  %v1458_v24 = vmax.f32 %v1456_v8, %v1457_v21  ;;  %v1469_v26 = vrot.slane %v1468_v55, 2  ;;  %v1511_v16 = vsel %vm1416_vm4, %v4407_v46, 0.0 }
 0x2a0   : > { %v3564_v19 = vpop.eup %3563  ;;  %v1794_v30 = vrot.slane %v1793_v39, 1  ;;  %v1508_v10 = vadd.f32 %v1507_v42, %v1506_v31  ;;  %v1489_v50 = vmul.f32 1.442695, %v1477_v15  ;;  %v1512_v27 = vrot.slane %v1511_v16, 4 }
 0x2a1   : > { %v1478_v14 = vsub.f32 %v4367_v2, %v1458_v24  ;;  %v1464_v34 = vrot.slane %v1463_v43, 1  ;;  %v1470_v57 = vmax.f32 %v1468_v55, %v1469_v26  ;;  %v1499_v45 = vadd.f32 %v1498_v49, %v1497_v53 }
 0x2a2   : > { %v1795_v0 = vadd.f32 %v1794_v30, %v1793_v39  ;;  %v1509_v22 = vrot.slane %v1508_v10, 1  ;;  %3571 = vpow2.f32 %v1489_v50  ;;  %v1513_v52 = vadd.f32 %v1512_v27, %v1511_v16 }
 0x2a3   : > { %v1491_v21 = vmul.f32 1.442695, %v1478_v14  ;;  %v1465_v63 = vmax.f32 %v1463_v43, %v1464_v34  ;;  %v1471_v8 = vrot.slane %v1470_v57, 1  ;;  %v1500_v31 = vrot.slane %v1499_v45, 2 }
 0x2a4   : > { %v3566_v56 = vpop.eup %3565  ;;  %3573 = vrcp.f32 %v1795_v0  ;;  %v1510_v20 = vadd.f32 %v1509_v22, %v1508_v10  ;;  %v4414_v62 = vmul.f32 %v4376_v36, %v4285_v58  ;;  %v1514_v2 = vrot.slane %v1513_v52, 2 }
 0x2a5   : > { %3575 = vpow2.f32 %v1491_v21  ;;  %v1479_v55 = vsub.f32 %v4383_v41, %v1465_v63  ;;  %v1472_v49 = vmax.f32 %v1470_v57, %v1471_v8  ;;  %v1501_v53 = vadd.f32 %v1500_v31, %v1499_v45 }
 0x2a6   : > { %3577 = vrcp.f32 %v1510_v20  ;;  %v4419_v39 = vmul.f32 %v4376_v36, %v4289_v4  ;;  %1822 = vst.msk [vmem:[%s4179_s26 + $0x10] sm:$0xff] %vm1603_vm3, %v4414_v62  ;;  %v4426_v58 = vmul.f32 %v4390_v60, %v4299_v28  ;;  %v1515_v15 = vadd.f32 %v1514_v2, %v1513_v52 }
 0x2a7   : > { %v3568_v42 = vpop.eup %3567  ;;  %v1493_v41 = vmul.f32 1.442695, %v1479_v55  ;;  %v1480_v24 = vsub.f32 %v4395_v33, %v1472_v49  ;;  %v4431_v43 = vmul.f32 %v4390_v60, %v4304_v32  ;;  %v1502_v4 = vrot.slane %v1501_v53, 1 }
 0x2a8   : > { %1823 = vst.msk [vmem:[%s4179_s26 + $0x18] sm:$0xff] %vm1603_vm3, %v4419_v39  ;;  %1824 = vst.msk [vmem:[%s4179_s26 + $0x20] sm:$0xff] %vm1603_vm3, %v4426_v58  ;;  %v4440_v28 = vmul.f32 %v3560_v17, %v4312_v61  ;;  %v4443_v36 = vmul.f32 %v3560_v17, %v4316_v23  ;;  %v1516_v26 = vrot.slane %v1515_v15, 1  ;;  %v4457_v23 = vmul.f32 %v3564_v19, %v4327_v44 }
 0x2a9   : > { %3579 = vpow2.f32 %v1493_v41  ;;  %v1495_v33 = vmul.f32 1.442695, %v1480_v24  ;;  %1825 = vst.msk [vmem:[%s4179_s26 + $0x28] sm:$0xff] %vm1603_vm3, %v4431_v43  ;;  %v1503_v32 = vadd.f32 %v1502_v4, %v1501_v53  ;;  %v4460_v60 = vmul.f32 %v3564_v19, %v4329_v1 }
 0x2aa   : > { %1826 = vst.msk [vmem:[%s4179_s26 + $0x30] sm:$0xff] %vm1603_vm3, %v4440_v28  ;;  %1827 = vst.msk [vmem:[%s4179_s26 + $0x38] sm:$0xff] %vm1603_vm3, %v4443_v36  ;;  %v2191_v61 = vpack.c.bf16 %v4443_v36, %v4440_v28  ;;  %v1517_v17 = vadd.f32 %v1516_v26, %v1515_v15  ;;  %v4463_v30 = vmul.f32 %v3566_v56, %v4337_v47 }
 0x2ab   : > { %3581 = vpow2.f32 %v1495_v33  ;;  %v4466_v10 = vmul.f32 %v3566_v56, %v4339_v18  ;;  %1828 = vst.msk [vmem:[%s4179_s26 + $0x40] sm:$0xff] %vm1603_vm3, %v4457_v23  ;;  %1829 = vst.msk [vmem:[%s4179_s26 + $0x48] sm:$0xff] %vm1603_vm3, %v4460_v60  ;;  %v2192_v44 = vpack.c.bf16 %v4460_v60, %v4457_v23  ;;  %v4479_v1 = vmul.f32 %v3568_v42, %v4346_v37 }
 0x2ac   : > { %v4468_v16 = vpop.eup %3569  ;;  %3583 = vrcp.f32 %v1503_v32  ;;  %v4482_v47 = vmul.f32 %v3568_v42, %v4348_v11  ;;  %1830 = vst.msk [vmem:[%s4179_s26 + $0x50] sm:$0xff] %vm1603_vm3, %v4463_v30 }
 0x2ad   : > { %3585 = vrcp.f32 %v1517_v17  ;;  %v1518_v18 = vsel %vm1416_vm4, %v4468_v16, 0.0  ;;  %1831 = vst.msk [vmem:[%s4179_s26 + $0x58] sm:$0xff] %vm1603_vm3, %v4466_v10  ;;  %v2193_v19 = vpack.c.bf16 %v4466_v10, %v4463_v30  ;;  %1832 = vst.msk [vmem:[%s4179_s26 + $0x60] sm:$0xff] %vm1603_vm3, %v4479_v1  ;;  %v4907_v17 = vmov 0.0  }
 0x2ae   : > { %v1519_v50 = vrot.slane %v1518_v18, 4  ;;  %1833 = vst.msk [vmem:[%s4179_s26 + $0x68] sm:$0xff] %vm1603_vm3, %v4482_v47  ;;  %v2194_v37 = vpack.c.bf16 %v4482_v47, %v4479_v1 }
 0x2af   : > { %v4502_v11 = vpop.eup %3571 }
 0x2b0   : > { %v1520_v27 = vadd.f32 %v1519_v50, %v1518_v18  ;;  %v1525_v14 = vsel %vm1416_vm4, %v4502_v11, 0.0 }
 0x2b1   : > { %v3574_v34 = vpop.eup %3573  ;;  %v1526_v57 = vrot.slane %v1525_v14, 4 }
 0x2b2   : > { %v4509_v0 = vpop.eup %3575  ;;  %v1521_v22 = vrot.slane %v1520_v27, 2  ;;  %v4512_v45 = vmul.f32 %v3574_v34, %v4372_v12  ;;  %v4515_v52 = vmul.f32 %v3574_v34, %v4380_v40 }
 0x2b3   : > { %v3578_v21 = vpop.eup %3577  ;;  %v1527_v63 = vadd.f32 %v1526_v57, %v1525_v14  ;;  %v1532_v8 = vsel %vm1416_vm4, %v4509_v0, 0.0 }
 0x2b4   : > { %v1522_v56 = vadd.f32 %v1521_v22, %v1520_v27  ;;  %v1533_v20 = vrot.slane %v1532_v8, 4  ;;  %v1562_v31 = vmul.f32 %v3578_v21, %v4397_v51  ;;  %1834 = vst.msk [vmem:[%s4179_s26 + $0x70] sm:$0xff] %vm1603_vm3, %v4512_v45  ;;  %1835 = vst.msk [vmem:[%s4179_s26 + $0x78] sm:$0xff] %vm1603_vm3, %v4515_v52  ;;  %v2195_v12 = vpack.c.bf16 %v4515_v52, %v4512_v45  ;;  %s2769_s26 = sand.u32 1, %s3896_s21  }
 0x2b5   : > { %v1528_v40 = vrot.slane %v1527_v63, 2 }
 0x2b6   : > { %v4529_v2 = vpop.eup %3579  ;;  %v1523_v55 = vrot.slane %v1522_v56, 1  ;;  %v1534_v49 = vadd.f32 %v1533_v20, %v1532_v8  ;;  %v1837_v53 = vpack.c.bf16 %v1562_v31, %v1562_v31  ;;  %1570 = vst.msk [vmem:[%s4531_s14 + $0x8] sm:$0xff] %vm1416_vm4, %v1562_v31 }
 0x2b7   : > { %v1529_v51 = vadd.f32 %v1528_v40, %v1527_v63  ;;  %v1539_v42 = vsel %vm1416_vm4, %v4529_v2, 0.0 }
 0x2b8   : > { %v4537_v15 = vpop.eup %3581  ;;  %v1524_v41 = vadd.f32 %v1523_v55, %v1522_v56  ;;  %v1535_v24 = vrot.slane %v1534_v49, 2  ;;  %v1540_v4 = vrot.slane %v1539_v42, 4  ;;  %3291 = vmatmul.mubr.msk.bf16.vlgmr.msra.gmra.mxu0 %vm1416_vm4, %v1837_v53 }
 0x2b9   : > { %v3584_v26 = vpop.eup %3583  ;;  %v1530_v33 = vrot.slane %v1529_v51, 1  ;;  %v1546_v32 = vsel %vm1416_vm4, %v4537_v15, 0.0  ;;  %3301 = vmatpush3.bf16.msra.mxu0 %v4061_v54  ;;  %3302 = vmatprep.mubr.msk.bf16.mxu0 %vm3795_vm0, %v4907_v17 }
 0x2ba   : > { %v3586_v18 = vpop.eup %3585  ;;  %3587 = vrcp.f32 %v1524_v41  ;;  %v1536_v50 = vadd.f32 %v1535_v24, %v1534_v49  ;;  %v1541_v27 = vadd.f32 %v1540_v4, %v1539_v42  ;;  %v1547_v14 = vrot.slane %v1546_v32, 4  ;;  %3312 = vmatprep.subr.bf16.mxu0 %v4907_v17 }
 0x2bb   : > { %v1531_v34 = vadd.f32 %v1530_v33, %v1529_v51  ;;  %v1561_v57 = vmul.f32 %v3584_v26, %v4385_v25  ;;  %v1563_v22 = vmul.f32 %v3586_v18, %v4407_v46  ;;  %v2338_v18 = vsel %vm2199_vm5, %v4035_v38, 0  ;;  %v4910_v38 = vld [vmem:[#allocation18_spill] sm:$0xff] }
 0x2bc   : > { %v1537_v21 = vrot.slane %v1536_v50, 1  ;;  %v1542_v63 = vrot.slane %v1541_v27, 2  ;;  %v1548_v54 = vadd.f32 %v1547_v14, %v1546_v32 }
 0x2bd   : > { %3589 = vrcp.f32 %v1531_v34  ;;  %v1836_v8 = vpack.c.bf16 %v1561_v57, %v1561_v57  ;;  %1569 = vst.msk [vmem:[%s4531_s14] sm:$0xff] %vm1416_vm4, %v1561_v57  ;;  %1571 = vst.msk [vmem:[%s4531_s14 + $0x10] sm:$0xff] %vm1416_vm4, %v1563_v22  ;;  %v1838_v49 = vpack.c.bf16 %v1563_v22, %v1563_v22 }
 0x2be   : > { %v1538_v56 = vadd.f32 %v1537_v21, %v1536_v50  ;;  %v1543_v20 = vadd.f32 %v1542_v63, %v1541_v27  ;;  %v1549_v31 = vrot.slane %v1548_v54, 2 }
 0x2bf   : > { %3285 = vmatmul.mubr.msk.bf16.vlgmr.msra.gmra.mxu1 %vm1416_vm4, %v1836_v8 }
 0x2c0   : > { %3591 = vrcp.f32 %v1538_v56  ;;  %v1544_v40 = vrot.slane %v1543_v20, 1  ;;  %v1550_v55 = vadd.f32 %v1549_v31, %v1548_v54  ;;  %3295 = vmatpush3.bf16.msra.mxu1 %v4050_v48  ;;  %3296 = vmatprep.mubr.msk.bf16.mxu1 %vm3795_vm0, %v4907_v17 }
 0x2c1   : > { %3306 = vmatprep.subr.bf16.mxu1 %v4907_v17 }
 0x2c2   : > { %v1545_v46 = vadd.f32 %v1544_v40, %v1543_v20  ;;  %v1551_v25 = vrot.slane %v1550_v55, 1 }
 0x2c4   : > { %3593 = vrcp.f32 %v1545_v46  ;;  %v1552_v53 = vadd.f32 %v1551_v25, %v1550_v55 }
 0x2c6   : > { %3595 = vrcp.f32 %v1552_v53 }
 0x2c7   : > { %v3588_v51 = vpop.eup %3587  ;;  %3297 = vmatmul.mubr.msk.bf16.vlgmr.msra.gmra.mxu1 %vm1416_vm4, %v1838_v49 }
 0x2c8   : > { %3307 = vmatpush3.bf16.msra.mxu1 %v4070_v59  ;;  %v1564_v48 = vmul.f32 %v3588_v51, %v4468_v16  ;;  %3308 = vmatprep.mubr.msk.bf16.mxu1 %vm3795_vm0, %v4907_v17 }
 0x2c9   : > { %3318 = vmatprep.subr.bf16.mxu1 %v4907_v17 }
 0x2ca   : > { %v3590_v42 = vpop.eup %3589  ;;  %v1839_v41 = vpack.c.bf16 %v1564_v48, %v1564_v48  ;;  %1572 = vst.msk [vmem:[%s4531_s14 + $0x18] sm:$0xff] %vm1416_vm4, %v1564_v48 }
 0x2cb   : > { %v1565_v24 = vmul.f32 %v3590_v42, %v4502_v11 }
 0x2cc   : > { %3303 = vmatmul.mubr.msk.bf16.vlgmr.msra.gmra.mxu0 %vm1416_vm4, %v1839_v41 }
 0x2cd   : > { %v3592_v4 = vpop.eup %3591  ;;  %3313 = vmatpush3.bf16.msra.mxu0 %v4083_v3  ;;  %v1840_v59 = vpack.c.bf16 %v1565_v24, %v1565_v24  ;;  %3314 = vmatprep.mubr.msk.bf16.mxu0 %vm3795_vm0, %v4907_v17  ;;  %1573 = vst.msk [vmem:[%s4531_s14 + $0x20] sm:$0xff] %vm1416_vm4, %v1565_v24 }
 0x2ce   : > { %3324 = vmatprep.subr.bf16.mxu0 %v4907_v17  ;;  %v1566_v16 = vmul.f32 %v3592_v4, %v4509_v0 }
 0x2cf   : > { %3309 = vmatmul.mubr.msk.bf16.vlgmr.msra.gmra.mxu1 %vm1416_vm4, %v1840_v59 }
 0x2d0   : > { %3319 = vmatpush3.bf16.msra.mxu1 %v4092_v9  ;;  %v1841_v11 = vpack.c.bf16 %v1566_v16, %v1566_v16  ;;  %3320 = vmatprep.mubr.msk.bf16.mxu1 %vm3795_vm0, %v4907_v17  ;;  %1574 = vst.msk [vmem:[%s4531_s14 + $0x28] sm:$0xff] %vm1416_vm4, %v1566_v16  ;;  %v2200_v9 = vsel %vm2199_vm5, %v4000_v7, 0  ;;  %v2246_v7 = vsel %vm2199_vm5, %v4028_v29, 0  ;;  %v2189_v29 = vpack.c.bf16 %v4419_v39, %v4414_v62  ;;  %v4911_v39 = vld [vmem:[#allocation19_spill] sm:$0xff] }
 0x2d1   : > { %v3594_v3 = vpop.eup %3593  ;;  %3330 = vmatprep.subr.bf16.mxu1 %v4907_v17  ;;  %v2430_v62 = vsel %vm2199_vm5, %v4910_v38, 0 }
 0x2d2   : > { %v1567_v26 = vmul.f32 %v3594_v3, %v4529_v2 }
 0x2d3   : > { %v3596_v33 = vpop.eup %3595 }
 0x2d4   : > { %3315 = vmatmul.mubr.msk.bf16.vlgmr.msra.gmra.mxu0 %vm1416_vm4, %v1841_v11  ;;  %v1842_v0 = vpack.c.bf16 %v1567_v26, %v1567_v26  ;;  %v1568_v32 = vmul.f32 %v3596_v33, %v4537_v15  ;;  %1575 = vst.msk [vmem:[%s4531_s14 + $0x30] sm:$0xff] %vm1416_vm4, %v1567_v26  ;;  %v2292_v15 = vsel %vm2199_vm5, %v4032_v35, 0  ;;  %v4909_v35 = vld [vmem:[#allocation17_spill] sm:$0xff] }
 0x2d5   : > { %3325 = vmatpush3.bf16.msra.mxu0 %v4101_v13  ;;  %3326 = vmatprep.mubr.msk.bf16.mxu0 %vm3795_vm0, %v4907_v17  ;;  %v4908_v13 = vpack.c.bf16 %v4183_v6, %v4181_v5  ;;  %v2190_v5 = vpack.c.bf16 %v4431_v43, %v4426_v58  ;;  %v2384_v6 = vsel %vm2199_vm5, %v4909_v35, 0  ;;  %v2476_v58 = vsel %vm2199_vm5, %v4911_v39, 0  ;;  %v4912_v43 = vld [vmem:[#allocation20_spill] sm:$0xff] }
 0x2d6   : > { %3336 = vmatprep.subr.bf16.mxu0 %v4907_v17  ;;  %1576 = vst.msk [vmem:[%s4531_s14 + $0x38] sm:$0xff] %vm1416_vm4, %v1568_v32  ;;  %v1843_v2 = vpack.c.bf16 %v1568_v32, %v1568_v32  ;;  %v2522_v28 = vsel %vm2199_vm5, %v4912_v43, 0 }
 0x2d7   : > { %3321 = vmatmul.mubr.msk.bf16.vlgmr.msra.gmra.mxu1 %vm1416_vm4, %v1842_v0 }
 0x2d8   : > { %3331 = vmatpush3.bf16.msra.mxu1 %v2200_v9  ;;  %3332 = vmatprep.mubr.msk.bf16.mxu1 %vm3795_vm0, %v4907_v17 }
 0x2d9   : > { %3342 = vmatprep.subr.bf16.mxu1 %v4907_v17 }
 0x2dc   : > { %3327 = vmatmul.mubr.msk.bf16.vlgmr.msra.gmra.mxu0 %vm1416_vm4, %v1843_v2 }
 0x2dd   : > { %3337 = vmatpush3.bf16.msra.mxu0 %v2246_v7  ;;  %3338 = vmatprep.mubr.msk.bf16.mxu0 %vm3795_vm0, %v4907_v17  ;;  %v3515_v7 = vld [vmem:[#allocation5 + $0x8] sm:$0xff]  }
 0x2de   : > { %3348 = vmatprep.subr.bf16.mxu0 %v4907_v17 }
 0x2df   : > { %3333 = vmatmul.mubr.msk.bf16.vlgmr.msra.gmra.mxu1 %vm1603_vm3, %v4908_v13 }
 0x2e0   : > { %3343 = vmatpush3.bf16.msra.mxu1 %v2292_v15  ;;  %3344 = vmatprep.mubr.msk.bf16.mxu1 %vm3795_vm0, %v4907_v17 }
 0x2e1   : > { %3354 = vmatprep.subr.bf16.mxu1 %v4907_v17 }
 0x2e4   : > { %3339 = vmatmul.mubr.msk.bf16.vlgmr.msra.gmra.mxu0 %vm1603_vm3, %v2189_v29 }
 0x2e5   : > { %3349 = vmatpush3.bf16.msra.mxu0 %v2338_v18  ;;  %3350 = vmatprep.mubr.msk.bf16.mxu0 %vm3795_vm0, %v4907_v17 }
 0x2e6   : > { %3360 = vmatprep.subr.bf16.mxu0 %v4907_v17 }
 0x2e7   : > { %3345 = vmatmul.mubr.msk.bf16.vlgmr.msra.gmra.mxu1 %vm1603_vm3, %v2190_v5  ;;  %v3516_v5 = vld [vmem:[#allocation5] sm:$0xff]  }
 0x2e8   : > { %3355 = vmatpush3.bf16.msra.mxu1 %v2384_v6  ;;  %3356 = vmatprep.mubr.msk.bf16.mxu1 %vm3795_vm0, %v4907_v17 }
 0x2e9   : > { %3366 = vmatprep.subr.bf16.mxu1 %v4907_v17 }
 0x2ec   : > { %3351 = vmatmul.mubr.msk.bf16.vlgmr.msra.gmra.mxu0 %vm1603_vm3, %v2191_v61 }
 0x2ed   : > { %3361 = vmatpush3.bf16.msra.mxu0 %v2430_v62  ;;  %3362 = vmatprep.mubr.msk.bf16.mxu0 %vm3795_vm0, %v4907_v17 }
 0x2ee   : > { %3372 = vmatprep.subr.bf16.mxu0 %v4907_v17 }
 0x2ef   : > { %3357 = vmatmul.mubr.msk.bf16.vlgmr.msra.gmra.mxu1 %vm1603_vm3, %v2192_v44 }
 0x2f0   : > { %3367 = vmatpush3.bf16.msra.mxu1 %v2476_v58  ;;  %3368 = vmatprep.mubr.msk.bf16.mxu1 %vm3795_vm0, %v4907_v17 }
 0x2f1   : > { %3378 = vmatprep.subr.bf16.mxu1 %v4907_v17 }
 0x2f4   : > { %3363 = vmatmul.mubr.msk.bf16.vlgmr.msra.gmra.mxu0 %vm1603_vm3, %v2193_v19 }
 0x2f5   : > { %3373 = vmatpush3.bf16.msra.mxu0 %v2522_v28  ;;  %3374 = vmatprep.mubr.msk.bf16.mxu0 %vm3795_vm0, %v4907_v17 }
 0x2f7   : > { %3369 = vmatmul.mubr.msk.bf16.vlgmr.msra.gmra.mxu1 %vm1603_vm3, %v2194_v37 }
 0x2f8   : > { %3382 = vmatprep.mubr.msk.bf16.mxu1 %vm3795_vm0, %v4907_v17  ;;  %3379 = vmatpush3.bf16.msra.mxu1 %v3515_v7 }
 0x2f9   : > { %3380 = vmatprep.subr.bf16.mxu1 %v4907_v17 }
 0x2fc   : > { %3375 = vmatmul.mubr.msk.bf16.vlgmr.msra.gmra.mxu0 %vm1603_vm3, %v2195_v12  ;;  %3381 = vmatpush3.bf16.msra.mxu1 %v3516_v5 }
 0x378   : > { %v4665_v36 = vpop.f32.mrf.mxu0 }
 0x37a   : > { %v3292_v61 = vpop.f32.mrf.mxu0 }
 0x37c   : > { %v1927_v23 = vpop.f32.mrf.mxu0 }
 0x37e   : > { %v3293_v60 = vpop.f32.mrf.mxu0 }
 0x37f   : > { %v4667_v30 = vpop.f32.mrf.mxu1 }
 0x381   : > { %v3286_v10 = vpop.f32.mrf.mxu1 }
 0x383   : > { %v1884_v44 = vpop.f32.mrf.mxu1 }
 0x384   : > { %v4913_v44 = vld [vmem:[#allocation16_spill] sm:$0xff] }
 0x385   : > { %v3287_v1 = vpop.f32.mrf.mxu1 }
 0x386   : > { %v583_v1 = vrot.slane %v4913_v44, 4 }
 0x387   : > { %v4669_v47 = vpop.f32.mrf.mxu1 }
 0x389   : > { %v3298_v19 = vpop.f32.mrf.mxu1 }
 0x38b   : > { %v1970_v37 = vpop.f32.mrf.mxu1 }
 0x38c   : > { %v4671_v50 = vpop.f32.mrf.mxu0 }
 0x38d   : > { %v3299_v27 = vpop.f32.mrf.mxu1 }
 0x38e   : > { %v3304_v45 = vpop.f32.mrf.mxu0 }
 0x38f   : > { %v4673_v52 = vpop.f32.mrf.mxu1 }
 0x390   : > { %v2013_v12 = vpop.f32.mrf.mxu0 }
 0x391   : > { %v3310_v14 = vpop.f32.mrf.mxu1  ;;  %v4708_v12 = vld [vmem:[%s3997_s30] sm:$0xff]  ;;  %s3040_s30 = sshll.u32 %s4505_s22, 3 }
 0x392   : > { %v3305_v34 = vpop.f32.mrf.mxu0  ;;  %s461_s4 = scalar_lea.vmem [#allocation8], %s3040_s30  ;;  %s3811_s30 = smov [#allocation8]  }
 0x393   : > { %v2056_v57 = vpop.f32.mrf.mxu1  ;;  %s3668_s2 = sshll.u32 %s3811_s30, 4  ;;  %s3669_s2 = int_to_ptr.vmem [resolvable:$false] %s3668_s2 }
 0x394   : > { %v4675_v22 = vpop.f32.mrf.mxu0  ;;  %s3670_s3 = scalar_lea.vmem %s3669_s2, 256 }
 0x395   : > { %v3311_v21 = vpop.f32.mrf.mxu1 }
 0x396   : > { %v3316_v63 = vpop.f32.mrf.mxu0 }
 0x397   : > { %v4677_v54 = vpop.f32.mrf.mxu1 }
 0x398   : > { %v2099_v8 = vpop.f32.mrf.mxu0 }
 0x399   : > { %v3322_v56 = vpop.f32.mrf.mxu1 }
 0x39a   : > { %v3317_v20 = vpop.f32.mrf.mxu0 }
 0x39b   : > { %v2142_v31 = vpop.f32.mrf.mxu1 }
 0x39c   : > { %v4679_v40 = vpop.f32.mrf.mxu0 }
 0x39d   : > { %v3323_v55 = vpop.f32.mrf.mxu1 }
 0x39e   : > { %v3328_v46 = vpop.f32.mrf.mxu0 }
 0x39f   : > { %v4681_v25 = vpop.f32.mrf.mxu1 }
 0x3a0   : > { %v2185_v49 = vpop.f32.mrf.mxu0 }
 0x3a1   : > { %v3334_v53 = vpop.f32.mrf.mxu1 }
 0x3a2   : > { %v3329_v51 = vpop.f32.mrf.mxu0 }
 0x3a3   : > { %v4683_v48 = vpop.f32.mrf.mxu1 }
 0x3a4   : > { %v2282_v42 = vpop.f32.mrf.mxu0 }
 0x3a5   : > { %2567 = vrot.lane.b32.xlu0 %v2282_v42, %s3804_s16  ;;  %v3335_v41 = vpop.f32.mrf.mxu1 }
 0x3a6   : > { %v3340_v24 = vpop.f32.mrf.mxu0 }
 0x3a7   : > { %v2328_v4 = vpop.f32.mrf.mxu1 }
 0x3a8   : > { %v2285_v59 = vpop.f32.mrf.mxu0 }
 0x3a9   : > { %2575 = vrot.lane.b32.xlu0 %v2328_v4, %s4880_s12  ;;  %2569 = vrot.lane.b32.xlu1 %v2285_v59, %s3804_s16  ;;  %v3346_v16 = vpop.f32.mrf.mxu1 }
 0x3aa   : > { %v3341_v11 = vpop.f32.mrf.mxu0 }
 0x3ab   : > { %v2331_v3 = vpop.f32.mrf.mxu1 }
 0x3ac   : > { %v2374_v26 = vpop.f32.mrf.mxu0 }
 0x3ad   : > { %2577 = vrot.lane.b32.xlu1 %v2331_v3, %s4880_s12  ;;  %2583 = vrot.lane.b32.xlu0 %v2374_v26, %s3806_s29  ;;  %v3347_v33 = vpop.f32.mrf.mxu1 }
 0x3ae   : > { %v3352_v0 = vpop.f32.mrf.mxu0 }
 0x3af   : > { %v2420_v32 = vpop.f32.mrf.mxu1 }
 0x3b0   : > { %v2377_v9 = vpop.f32.mrf.mxu0 }
 0x3b1   : > { %2591 = vrot.lane.b32.xlu0 %v2420_v32, %s3807_s24  ;;  %2585 = vrot.lane.b32.xlu1 %v2377_v9, %s3806_s29  ;;  %v3358_v2 = vpop.f32.mrf.mxu1 }
 0x3b2   : > { %v3353_v13 = vpop.f32.mrf.mxu0 }
 0x3b3   : > { %v2423_v15 = vpop.f32.mrf.mxu1 }
 0x3b4   : > { %v2466_v29 = vpop.f32.mrf.mxu0 }
 0x3b5   : > { %2593 = vrot.lane.b32.xlu1 %v2423_v15, %s3807_s24  ;;  %2599 = vrot.lane.b32.xlu0 %v2466_v29, %s3808_s25  ;;  %v3359_v18 = vpop.f32.mrf.mxu1 }
 0x3b6   : > { %v3364_v35 = vpop.f32.mrf.mxu0 }
 0x3b7   : > { %v2512_v6 = vpop.f32.mrf.mxu1 }
 0x3b8   : > { %v2469_v38 = vpop.f32.mrf.mxu0 }
 0x3b9   : > { %2607 = vrot.lane.b32.xlu0 %v2512_v6, %s3809_s0  ;;  %2601 = vrot.lane.b32.xlu1 %v2469_v38, %s3808_s25  ;;  %v3370_v62 = vpop.f32.mrf.mxu1 }
 0x3ba   : > { %v3365_v39 = vpop.f32.mrf.mxu0 }
 0x3bb   : > { %v2515_v58 = vpop.f32.mrf.mxu1 }
 0x3bc   : > { %v2558_v43 = vpop.f32.mrf.mxu0 }
 0x3bd   : > { %2609 = vrot.lane.b32.xlu1 %v2515_v58, %s3809_s0  ;;  %2615 = vrot.lane.b32.xlu0 %v2558_v43, %s3810_s1  ;;  %v3371_v17 = vpop.f32.mrf.mxu1 }
 0x3be   : > { %v3376_v28 = vpop.f32.mrf.mxu0 }
 0x3c0   : > { %v2561_v61 = vpop.f32.mrf.mxu0 }
 0x3c1   : > { %2642 = vrot.lane.b32.xlu0 %v4665_v36, %s3804_s16  ;;  %2617 = vrot.lane.b32.xlu1 %v2561_v61, %s3810_s1 }
 0x3c2   : > { %v3377_v23 = vpop.f32.mrf.mxu0 }
 0x3c5   : > { %2650 = vrot.lane.b32.xlu0 %v4671_v50, %s3806_s29  ;;  %2646 = vrot.lane.b32.xlu1 %v4669_v47, %s4880_s12  ;;  %v584_v50 = vadd.f32 %v583_v1, %v4913_v44 }
 0x3c7   : > { %v585_v45 = vrot.slane %v584_v50, 2 }
 0x3c9   : > { %2658 = vrot.lane.b32.xlu0 %v4675_v22, %s3808_s25  ;;  %2654 = vrot.lane.b32.xlu1 %v4673_v52, %s3807_s24  ;;  %v591_v52 = vsel %vm535_vm1, %v4708_v12, 0.0  ;;  %v586_v22 = vadd.f32 %v585_v45, %v584_v50  ;;  %s4745_s24 = scalar_lea.hbm %s4867_s9, %s3098_s15  ;;  %s2809_s25 = sshll.u32 %s461_s4, 4  ;;  %s2810_s25 = int_to_ptr.vmem [resolvable:$true] %s2809_s25 }
 0x3ca   : > { %v592_v14 = vrot.slane %v591_v52, 4  ;;  %s3664_s12 = scalar_lea.vmem %s2810_s25, 128  ;;  %p3671_p11 = scmp.lt.s32.totalorder %s2810_s25, %s3669_s2 }
 0x3cb   : > { %v587_v8 = vrot.slane %v586_v22, 1  ;;  %p3665_p10 = scmp.ne.s32.totalorder %s2810_s25, %s3664_s12  ;;  %p3672_p0 = scmp.lt.s32.totalorder %s3670_s3, %s3664_s12 }
 0x3cc   : > { %v593_v21 = vadd.f32 %v592_v14, %v591_v52 }
 0x3cd   : > { %2666 = vrot.lane.b32.xlu0 %v4679_v40, %s3810_s1  ;;  %2662 = vrot.lane.b32.xlu1 %v4677_v54, %s3809_s0  ;;  %v588_v51 = vadd.f32 %v587_v8, %v586_v22  ;;  %s2822_s0 = sshll.u32 %s4531_s14, 4  ;;  %s4748_s1 = scalar_lea.sflag [#allocation9], %s2769_s26  ;;  %s4767_s0 = int_to_ptr.vmem [resolvable:$true] %s2822_s0 }
 0x3ce   : > { %v594_v55 = vrot.slane %v593_v21, 2  ;;  %p3666_p12 = pnand %p3665_p10, %p3915_p5  ;;  %p3673_p1 = por %p3672_p0, %p3671_p11 }
 0x3cf   : > { %v590_v3 = vmul.f32 0.0625, %v588_v51 }
 0x3d0   : > { %v595_v16 = vadd.f32 %v594_v55, %v593_v21  ;;  %p3667_p8 = pneg %p3666_p12 }
 0x3d2   : > { %v596_v2 = vrot.slane %v595_v16, 1  ;;  %p3674_p3 = pnand %p3673_p1, %p3667_p8 }
 0x3d4   : > { %v597_v5 = vadd.f32 %v596_v2, %v595_v16 }
 0x3d6   : > { %v599_v39 = vmul.f32 0.125, %v597_v5 }
 0x417   : > { %v2568_v60 = vpop.permute.xlu0 %2567 }
 0x418   : > { %v2621_v56 = vsel %vm682_vm2, %v4681_v25, %v2568_v60 }
 0x41b   : > { %v2576_v36 = vpop.permute.xlu0 %2575  ;;  %v2570_v10 = vpop.permute.xlu1 %2569 }
 0x41c   : > { %v2623_v20 = vsel %vm1603_vm3, %v2621_v56, %v2576_v36  ;;  %v2622_v31 = vsel %vm682_vm2, %v4683_v48, %v2570_v10 }
 0x41f   : > { %v2578_v19 = vpop.permute.xlu1 %2577  ;;  %v2584_v37 = vpop.permute.xlu0 %2583 }
 0x420   : > { %v2626_v40 = vsel %vm2625_vm6, %v2623_v20, %v2584_v37  ;;  %v2624_v46 = vsel %vm1603_vm3, %v2622_v31, %v2578_v19 }
 0x423   : > { %v2592_v27 = vpop.permute.xlu0 %2591  ;;  %v2586_v47 = vpop.permute.xlu1 %2585 }
 0x424   : > { %v2628_v49 = vsel %vm1416_vm4, %v2626_v40, %v2592_v27  ;;  %v2627_v25 = vsel %vm2625_vm6, %v2624_v46, %v2586_v47 }
 0x427   : > { %v2594_v34 = vpop.permute.xlu1 %2593  ;;  %v2600_v57 = vpop.permute.xlu0 %2599 }
 0x428   : > { %v2631_v41 = vsel %vm2630_vm7, %v2628_v49, %v2600_v57  ;;  %v2629_v24 = vsel %vm1416_vm4, %v2627_v25, %v2594_v34 }
 0x42b   : > { %v2608_v63 = vpop.permute.xlu0 %2607  ;;  %v2602_v54 = vpop.permute.xlu1 %2601 }
 0x42c   : > { %v2634_v48 = vsel %vm2633_vm8, %v2631_v41, %v2608_v63  ;;  %v2632_v4 = vsel %vm2630_vm7, %v2629_v24, %v2602_v54 }
 0x42f   : > { %v2610_v53 = vpop.permute.xlu1 %2609  ;;  %v2616_v42 = vpop.permute.xlu0 %2615 }
 0x430   : > { %v2637_v59 = vsel %vm2636_vm9, %v2634_v48, %v2616_v42  ;;  %v2635_v11 = vsel %vm2633_vm8, %v2632_v4, %v2610_v53 }
 0x431   : > { %v2639_v32 = vmul.f32 %v2637_v59, %v590_v3 }
 0x433   : > { %v2643_v26 = vpop.permute.xlu0 %2642  ;;  %v2618_v33 = vpop.permute.xlu1 %2617 }
 0x434   : > { %v2638_v0 = vsel %vm2636_vm9, %v2635_v11, %v2618_v33  ;;  %v2669_v7 = vsel %vm682_vm2, %v4667_v30, %v2643_v26 }
 0x435   : > { %v2640_v9 = vmul.f32 %v2638_v0, %v590_v3 }
 0x437   : > { %v2677_v13 = vpack.c.bf16 %v2640_v9, %v2639_v32  ;;  %v2651_v15 = vpop.permute.xlu0 %2650  ;;  %v2647_v29 = vpop.permute.xlu1 %2646 }
 0x438   : > { %v2670_v18 = vsel %vm1603_vm3, %v2669_v7, %v2647_v29 }
 0x439   : > { %3383 = vmatmul.mubr.msk.bf16.vlgmr.msra.gmra.mxu1 %vm535_vm1, %v2677_v13  ;;  %v2671_v6 = vsel %vm2625_vm6, %v2670_v18, %v2651_v15 }
 0x43b   : > { %v2659_v35 = vpop.permute.xlu0 %2658  ;;  %v2655_v38 = vpop.permute.xlu1 %2654 }
 0x43c   : > { %v2672_v62 = vsel %vm1416_vm4, %v2671_v6, %v2655_v38 }
 0x43d   : > { %v2673_v30 = vsel %vm2630_vm7, %v2672_v62, %v2659_v35 }
 0x43f   : > { %v2667_v58 = vpop.permute.xlu0 %2666  ;;  %v2663_v43 = vpop.permute.xlu1 %2662 }
 0x440   : > { %v2674_v17 = vsel %vm2633_vm8, %v2673_v30, %v2663_v43 }
 0x441   : > { %v2675_v28 = vsel %vm2636_vm9, %v2674_v17, %v2667_v58 }
 0x442   : > { %v2676_v61 = vmul.f32 %v2675_v28, %v599_v39 }
 0x444   : > { %v3092_v23 = vmul.f32 -1.442695, %v2676_v61 }
 0x446   : > { %3597 = vpow2.f32 %v3092_v23 }
 0x453   : > { %v3598_v60 = vpop.eup %3597 }
 0x454   : > { %v2759_v36 = vadd.f32 1.0, %v3598_v60 }
 0x456   : > { %3599 = vrcp.f32 %v2759_v36 }
 0x463   : > { %v3600_v10 = vpop.eup %3599 }
 0x464   : > { %v2762_v44 = vmul.f32 %v4708_v12, %v3600_v10 }
 0x466   : > { %2763 = vst.msk [vmem:[%s461_s4] sm:$0xff] %vm535_vm1, %v2762_v44 }
 0x467   : > { %3677 = shalt.err (!%p3674_p3)
}
 0x468   : > { %s3678_s14 = scalar_lea.hbm %s4745_s24, 128  ;;  %s3682_s15 = scalar_lea.hbm %s4867_s9, 256 }
 0x469   : > { %p3679_p2 = scmp.ne.s32.totalorder %s4745_s24, %s3678_s14  ;;  %p3683_p7 = scmp.lt.s32.totalorder %s4745_s24, %s4867_s9 }
 0x46a   : > { %p3684_p6 = scmp.lt.s32.totalorder %s3682_s15, %s3678_s14 }
 0x46b   : > { %p3680_p4 = pnand %p3679_p2, %p3915_p5 }
 0x46c   : > { %p3685_p9 = por %p3684_p6, %p3683_p7 }
 0x46d   : > { %p3681_p13 = pneg %p3680_p4 }
 0x46f   : > { %p3686_p10 = pnand %p3685_p9, %p3681_p13 }
 0x471   : > { %3689 = shalt.err (!%p3686_p10)
}
 0x472   : > { %3395 = dma.vmem_to_hbm [thread:$0]  (%p3915_p5), %s2810_s25, 128, %s4745_s24, %s4748_s1  }
 0x473   : > { %s3107_s2 = sshll.u32 %s3896_s21, 10  ;;  %s3690_s14 = scalar_lea.vmem %s4767_s0, 1024 }
 0x474   : > { %s4773_s30 = scalar_lea.hbm %s4868_s10, %s3107_s2  ;;  %p3691_p12 = scmp.ne.s32.totalorder %s4767_s0, %s3690_s14 }
 0x475   : > { %s3812_s4 = smov [#allocation10]  }
 0x476   : > { %p3692_p8 = pnand %p3691_p12, %p3915_p5  ;;  %s3694_s26 = sshll.u32 %s3812_s4, 4  ;;  %s3695_s26 = int_to_ptr.vmem [resolvable:$false] %s3694_s26 }
 0x477   : > { %s3696_s24 = scalar_lea.vmem %s3695_s26, 2048  ;;  %p3697_p0 = scmp.lt.s32.totalorder %s4767_s0, %s3695_s26 }
 0x478   : > { %p3693_p11 = pneg %p3692_p8  ;;  %p3698_p1 = scmp.lt.s32.totalorder %s3696_s24, %s3690_s14 }
 0x47a   : > { %p3699_p3 = por %p3698_p1, %p3697_p0 }
 0x47c   : > { %p3700_p2 = pnand %p3699_p3, %p3693_p11 }
 0x47e   : > { %3703 = shalt.err (!%p3700_p2)
}
 0x47f   : > { %s3704_s25 = scalar_lea.hbm %s4773_s30, 1024  ;;  %s3708_s29 = scalar_lea.hbm %s4868_s10, 2048 }
 0x480   : > { %p3705_p4 = scmp.ne.s32.totalorder %s4773_s30, %s3704_s25  ;;  %p3709_p6 = scmp.lt.s32.totalorder %s4773_s30, %s4868_s10 }
 0x481   : > { %p3710_p9 = scmp.lt.s32.totalorder %s3708_s29, %s3704_s25 }
 0x482   : > { %p3706_p13 = pnand %p3705_p4, %p3915_p5 }
 0x483   : > { %p3711_p10 = por %p3710_p9, %p3709_p6 }
 0x484   : > { %p3707_p7 = pneg %p3706_p13 }
 0x486   : > { %p3712_p12 = pnand %p3711_p10, %p3707_p7 }
 0x488   : > { %3715 = shalt.err (!%p3712_p12)
}
 0x489   : > { %s3813_s12 = smov 128   ;;  %s4914_s14 = smov 8   ;;  %v3086_v1 = vld [vmem:[%s4865_s7] ss:$0 sm:$0xff]  ;;  %v3611_v56 = vld [vmem:[%s3982_s13 + $0x8] sm:$0xff] }
 0x48a   : > { %3396 = dma.vmem_to_hbm [thread:$0]  (%p3915_p5), %s4767_s0, 1024, %s4773_s30, %s4748_s1, %s3813_s12, %s3813_s12, %s4914_s14  }
 0x48b   : > { %s3039_s0 = sshll.u32 %s4505_s22, 4  ;;  %v3610_v63 = vld [vmem:[%s3982_s13] sm:$0xff]  ;;  %s3106_s1 = sshll.u32 %s3896_s21, 8 }
 0x48c   : > { %s454_s30 = scalar_lea.vmem [#allocation7], %s3039_s0  ;;  %s4810_s16 = scalar_lea.hbm %s4866_s8, %s3106_s1 }
 0x48d   : > { %s2793_s24 = sshll.u32 %s454_s30, 4  ;;  %s2765_s21 = scalar_lea.sflag [#allocation4], %s4505_s22  ;;  %s4812_s24 = int_to_ptr.vmem [resolvable:$true] %s2793_s24 }
 0x48e   : > { %s3716_s29 = scalar_lea.vmem %s4812_s24, 256  ;;  %s3814_s13 = smov [#allocation7]  }
 0x48f   : > { %p3717_p8 = scmp.ne.s32.totalorder %s4812_s24, %s3716_s29  ;;  %s3720_s2 = sshll.u32 %s3814_s13, 4  ;;  %s3721_s2 = int_to_ptr.vmem [resolvable:$false] %s3720_s2 }
 0x490   : > { %s3722_s3 = scalar_lea.vmem %s3721_s2, 512  ;;  %p3723_p1 = scmp.lt.s32.totalorder %s4812_s24, %s3721_s2 }
 0x491   : > { %p3718_p11 = pnand %p3717_p8, %p3915_p5  ;;  %p3724_p3 = scmp.lt.s32.totalorder %s3722_s3, %s3716_s29 }
 0x493   : > { %p3719_p0 = pneg %p3718_p11  ;;  %p3725_p2 = por %p3724_p3, %p3723_p1 }
 0x495   : > { %p3726_p4 = pnand %p3725_p2, %p3719_p0 }
 0x4f9   : > { %v2733_v19 = vpop.f32.mrf.mxu1 }
 0x4fa   : > { %v2734_v37 = vadd.f32 %v3086_v1, %v2733_v19 }
 0x4fb   : > { %v3384_v50 = vpop.f32.mrf.mxu1 }
 0x4fc   : > { %v3090_v27 = vmul.f32 -1.442695, %v2734_v37 }
 0x4fd   : > { %v2736_v47 = vpop.f32.mrf.mxu1 }
 0x4fe   : > { %3601 = vpow2.f32 %v3090_v27  ;;  %v2737_v45 = vadd.f32 %v3086_v1, %v2736_v47 }
 0x4ff   : > { %v3385_v12 = vpop.f32.mrf.mxu1 }
 0x500   : > { %v3091_v52 = vmul.f32 -1.442695, %v2737_v45 }
 0x502   : > { %3603 = vpow2.f32 %v3091_v52 }
 0x50b   : > { %v3602_v14 = vpop.eup %3601 }
 0x50c   : > { %v2746_v34 = vadd.f32 1.0, %v3602_v14 }
 0x50e   : > { %3605 = vrcp.f32 %v2746_v34 }
 0x50f   : > { %v3604_v57 = vpop.eup %3603 }
 0x510   : > { %v2747_v22 = vadd.f32 1.0, %v3604_v57 }
 0x512   : > { %3607 = vrcp.f32 %v2747_v22 }
 0x51b   : > { %v3606_v21 = vpop.eup %3605 }
 0x51c   : > { %v2752_v54 = vmul.f32 %v3610_v63, %v3606_v21 }
 0x51e   : > { %2754 = vst.msk [vmem:[%s454_s30] sm:$0xff] %vm535_vm1, %v2752_v54 }
 0x51f   : > { %v3608_v8 = vpop.eup %3607 }
 0x520   : > { %v2753_v20 = vmul.f32 %v3611_v56, %v3608_v8 }
 0x522   : > { %2755 = vst.msk [vmem:[%s454_s30 + $0x8] sm:$0xff] %vm535_vm1, %v2753_v20 }
 0x523   : > { %3729 = shalt.err (!%p3726_p4)
}
 0x524   : > { %s3730_s4 = scalar_lea.hbm %s4810_s16, 256  ;;  %s3734_s0 = scalar_lea.hbm %s4866_s8, 512 }
 0x525   : > { %p3731_p13 = scmp.ne.s32.totalorder %s4810_s16, %s3730_s4  ;;  %p3735_p9 = scmp.lt.s32.totalorder %s4810_s16, %s4866_s8 }
 0x526   : > { %p3736_p10 = scmp.lt.s32.totalorder %s3734_s0, %s3730_s4 }
 0x527   : > { %p3732_p7 = pnand %p3731_p13, %p3915_p5 }
 0x528   : > { %p3737_p12 = por %p3736_p10, %p3735_p9 }
 0x529   : > { %p3733_p6 = pneg %p3732_p7 }
 0x52b   : > { %p3738_p8 = pnand %p3737_p12, %p3733_p6 }
 0x52d   : > { %3741 = shalt.err (!%p3738_p8)
}
 0x52e   : > { %3394 = dma.vmem_to_hbm [thread:$0]  (%p3915_p5), %s4812_s24, 256, %s4810_s16, %s2765_s21, %s3813_s12, %s3813_s12, %s4914_s14  }
 0x52f PF: > { %p3421_p11 = scmp.ge.s32.totalorder %s3788_s20, 2  ;;  %s2840_s25 = sand.u32 1, %s3776_s17  }
 0x530   : > { %p4915_p0 = scmp.ne.s32.totalorder %s4889_s28, 0  ;;  %s2841_s15 = scalar_lea.sflag [#allocation4], %s2840_s25 }
 0x532   : > { %p3408_p1 = pnand %p3421_p11, %p4915_p0 }
 0x534   : > { %p3409_p3 = pneg %p3408_p1 }
 0x536   : > { %3767 = dma.done.wait (%p3409_p3), %s2841_s15, 256  }
 0x537   : > { %3769 = vsyncadd (%p3409_p3), %s2841_s15, 4294967040  ;;  %s4916_s27 = sadd.s32 4294967294, %s3788_s20  }
 0x538   : > { %s2849_s29 = sand.u32 1, %s4916_s27  }
 0x539   : > { %s2850_s13 = scalar_lea.sflag [#allocation9], %s2849_s29 }
 0x53a   : > { %3771 = dma.done.wait (%p3409_p3), %s2850_s13, 1152  }
 0x53b   : > { %3773 = vsyncadd (%p3409_p3), %s2850_s13, 4294966144  ;;  %s4917_s12 = sld [smem:[#allocation15_spill]]  ;;  %p27_p5 = scmp.ge.s32.totalorder %s3900_s23, 4  }
 0x53c   : > { %s4918_s17 = smov %s3780_s18  ;;  %s4919_s18 = smov %s3784_s19 }
 0x53d   : > { %s4921_s20 = smov %s3900_s23  ;;  %29 = sbr.rel (!%p27_p5) target bundleno = 13 (0xd), region = 149 }
 0x541   : > { %s4920_s19 = smov %s4917_s12 }
 0x542   :  { %2872 = vsyncpa [#allocation3], 1 }
 0x543   :  { %2874 = vsyncpa [#allocation3 + $0x1], 1 }
 0x544   :  { %2875 = vsyncpa [#allocation6], 1 }
 0x545   :  { %2876 = vsyncpa [#allocation4], 1 }
 0x546   :  { %2878 = vsyncpa [#allocation4 + $0x1], 1 }
 0x547   :  { %2879 = vsyncpa [#allocation9], 1 }
 0x548   :  { %2881 = vsyncpa [#allocation9 + $0x1], 1 }

</bundles_post_ra>
